<compile_context>
chip_gen: v5e
topology: v5e:2x2
jax: 0.10.0
libtpu: 0.0.40
codegen_flags: <defaults>
</compile_context>

<pallas_src>
import functools

import jax
import jax.numpy as jnp
from jax.experimental import pallas as pl
from jax.experimental.pallas import tpu as pltpu

EPS = 1e-5


# ----------------------------------------------------------------------------
# Stage 1: relu( bn2( conv1x1( relu?( bn1(x) ) ) ) )          (M-tiled, fused)
# ----------------------------------------------------------------------------
def _stage1_kernel(x_ref, w_ref, ps_ref, pb_ref, qb_ref, o_ref, *,
                   pre_relu, compute_dtype):
    # x_ref: (TM, Cin); w_ref: (Cin, Cb) with bn2 scale pre-folded (bf16)
    # ps/pb: (1, Cin) bn1 scale / bias;  qb: (1, Cb) bn2 bias
    h = x_ref[...].astype(jnp.float32) * ps_ref[...] + pb_ref[...]
    if pre_relu:
        h = jnp.maximum(h, 0.0)
    y = jnp.dot(h.astype(compute_dtype), w_ref[...],
                preferred_element_type=jnp.float32)
    y = jnp.maximum(y + qb_ref[...], 0.0)
    o_ref[...] = y.astype(o_ref.dtype)


def fused_1x1_bn_relu(x2d, w_folded, pre_scale, pre_bias, post_bias, *,
                      pre_relu, compute_dtype, out_dtype, tile_rows=512):
    M, Cin = x2d.shape
    Cout = w_folded.shape[1]
    tm = M if M <= tile_rows else tile_rows          # tile_rows is mult. of 8
    kern = functools.partial(_stage1_kernel, pre_relu=pre_relu,
                             compute_dtype=compute_dtype)
    return pl.pallas_call(
        kern,
        grid=(pl.cdiv(M, tm),),
        in_specs=[pl.BlockSpec((tm, Cin), lambda i: (i, 0)),
                  pl.BlockSpec((Cin, Cout), lambda i: (0, 0)),
                  pl.BlockSpec((1, Cin), lambda i: (0, 0)),
                  pl.BlockSpec((1, Cin), lambda i: (0, 0)),
                  pl.BlockSpec((1, Cout), lambda i: (0, 0))],
        out_specs=pl.BlockSpec((tm, Cout), lambda i: (i, 0)),
        out_shape=jax.ShapeDtypeStruct((M, Cout), out_dtype),
        compiler_params=pltpu.CompilerParams(
            dimension_semantics=("parallel",)),
    )(x2d, w_folded.astype(compute_dtype),
      pre_scale.reshape(1, Cin).astype(jnp.float32),
      pre_bias.reshape(1, Cin).astype(jnp.float32),
      post_bias.reshape(1, Cout).astype(jnp.float32))


# ----------------------------------------------------------------------------
# Stage 2: relu( bn3( conv3x3_stride(a1) ) )     (grid over (image, out-row))
# ----------------------------------------------------------------------------
def _conv3x3_kernel(r0_ref, r1_ref, r2_ref, w_ref, b_ref, o_ref, *,
                    mo, n_wtaps, compute_dtype):
    # r*_ref: one (padded, possibly column-paired) input row per kh tap,
    #         shape (Wc, Cc).  im2col over the W taps -> one MXU matmul.
    pieces = []
    for r_ref in (r0_ref, r1_ref, r2_ref):
        row = r_ref[...]
        for t in range(n_wtaps):
            pieces.append(row[t:t + mo, :])          # unit-stride static slice
    patch = jnp.concatenate(pieces, axis=-1).astype(compute_dtype)
    y = jnp.dot(patch, w_ref[...], preferred_element_type=jnp.float32)
    y = jnp.maximum(y + b_ref[...], 0.0)
    o_ref[...] = y.astype(o_ref.dtype)


def conv3x3_bn_relu(a1, w2_hwio, scale, bias, *, stride, compute_dtype,
                    out_dtype):
    """3x3 / pad 1 / stride {1,2} conv, fused bn3 + ReLU, strided output only."""
    N, H, W, C = a1.shape
    Cout = w2_hwio.shape[-1]
    Ho = (H - 1) // stride + 1
    Wo = (W - 1) // stride + 1
    w2f = w2_hwio.astype(jnp.float32) * scale[None, None, None, :]  # fold bn3

    # TODO(synk): this pad is an extra XLA pass over a1; fold it into stage-1's
    #             output BlockSpec to remove it.
    xpad = jnp.pad(a1, ((0, 0), (1, 1), (1, 1), (0, 0)))

    if stride == 1:
        xk = xpad                                     # (N, H+2, W+2, C)
        wk = w2f.reshape(9 * C, Cout)                 # rows ordered (kh, kw, ci)
        n_wtaps, mo, cc = 3, W, C
    elif stride == 2:
        if H % 2 or W % 2:
            raise NotImplementedError("stride-2 path assumes even H, W")
        # Pair adjacent padded columns into channels (free row-major reshape):
        # out[ow] = pair[ow].first*w0 + pair[ow].second*w1 + pair[ow+1].first*w2
        xk = xpad.reshape(N, H + 2, (W + 2) // 2, 2 * C)
        blocks = []
        for kh in range(3):
            blocks.append(jnp.concatenate(
                [w2f[kh, 0], w2f[kh, 1], w2f[kh, 2],
                 jnp.zeros((C, Cout), jnp.float32)], axis=0))       # (4C, Cout)
        wk = jnp.concatenate(blocks, axis=0)                        # (12C, Cout)
        n_wtaps, mo, cc = 2, Wo, 2 * C
    else:
        raise NotImplementedError("stride must be 1 or 2")

    Wc = xk.shape[2]
    kern = functools.partial(_conv3x3_kernel, mo=mo, n_wtaps=n_wtaps,
                             compute_dtype=compute_dtype)

    def row_spec(kh):
        # H-stride handled here: output row `oh` reads padded rows oh*s + kh.
        return pl.BlockSpec(
            (None, None, Wc, cc),
            lambda n, oh, _kh=kh: (n, oh * stride + _kh, 0, 0))

    return pl.pallas_call(
        kern,
        grid=(N, Ho),
        in_specs=[row_spec(0), row_spec(1), row_spec(2),
                  pl.BlockSpec((wk.shape[0], Cout), lambda n, oh: (0, 0)),
                  pl.BlockSpec((1, Cout), lambda n, oh: (0, 0))],
        out_specs=pl.BlockSpec((None, None, Wo, Cout),
                               lambda n, oh: (n, oh, 0, 0)),
        out_shape=jax.ShapeDtypeStruct((N, Ho, Wo, Cout), out_dtype),
        compiler_params=pltpu.CompilerParams(
            dimension_semantics=("parallel", "parallel")),
    )(xk, xk, xk, wk.astype(compute_dtype),
      bias.reshape(1, Cout).astype(jnp.float32))


# ----------------------------------------------------------------------------
# Stage 3: bn4?( conv1x1(a2) ) + shortcut        (M-tiled, shortcut fused in)
# ----------------------------------------------------------------------------
def _stage3_kernel(*refs, has_proj, compute_dtype):
    if has_proj:
        a_ref, w_ref, b_ref, xs_ref, wsc_ref, o_ref = refs
    else:
        a_ref, w_ref, b_ref, xs_ref, o_ref = refs
    y = jnp.dot(a_ref[...].astype(compute_dtype), w_ref[...],
                preferred_element_type=jnp.float32)
    y = y + b_ref[...]
    if has_proj:
        y = y + jnp.dot(xs_ref[...].astype(compute_dtype), wsc_ref[...],
                        preferred_element_type=jnp.float32)
    else:
        y = y + xs_ref[...].astype(jnp.float32)
    o_ref[...] = y.astype(o_ref.dtype)


def fused_1x1_residual(a2d, w_folded, bias, xs, wsc=None, *, compute_dtype,
                       out_dtype, tile_rows=512):
    M, Cb = a2d.shape
    Cout = w_folded.shape[1]
    Cx = xs.shape[1]
    tm = M if M <= tile_rows else tile_rows
    has_proj = wsc is not None

    args = [a2d, w_folded.astype(compute_dtype),
            bias.reshape(1, Cout).astype(jnp.float32), xs]
    in_specs = [pl.BlockSpec((tm, Cb), lambda i: (i, 0)),
                pl.BlockSpec((Cb, Cout), lambda i: (0, 0)),
                pl.BlockSpec((1, Cout), lambda i: (0, 0)),
                pl.BlockSpec((tm, Cx), lambda i: (i, 0))]
    if has_proj:
        args.append(wsc.astype(compute_dtype))
        in_specs.append(pl.BlockSpec((Cx, Cout), lambda i: (0, 0)))

    kern = functools.partial(_stage3_kernel, has_proj=has_proj,
                             compute_dtype=compute_dtype)
    return pl.pallas_call(
        kern,
        grid=(pl.cdiv(M, tm),),
        in_specs=in_specs,
        out_specs=pl.BlockSpec((tm, Cout), lambda i: (i, 0)),
        out_shape=jax.ShapeDtypeStruct((M, Cout), out_dtype),
        compiler_params=pltpu.CompilerParams(
            dimension_semantics=("parallel",)),
    )(*args)


# ----------------------------------------------------------------------------
# Block wrapper (BN folding, layout plumbing)
# ----------------------------------------------------------------------------
def _fold_bn(bp):
    scale = bp['gamma'] / jnp.sqrt(bp['var'] + EPS)
    return scale, bp['beta'] - bp['mean'] * scale


def bottleneck_block_forward(x_nchw, params, *, stride, remove_first_relu,
                             add_last_bn, compute_dtype=jnp.bfloat16,
                             tile_rows=512):
    N, Cin, H, W = x_nchw.shape
    Cb = params['w1'].shape[0]
    Cout = params['w3'].shape[0]

    s1, b1 = _fold_bn(params['bn1'])
    s2, b2 = _fold_bn(params['bn2'])
    s3, b3 = _fold_bn(params['bn3'])
    if add_last_bn:
        s4, b4 = _fold_bn(params['bn4'])
    else:
        s4 = jnp.ones((Cout,), jnp.float32)
        b4 = jnp.zeros((Cout,), jnp.float32)

    # Fold the post-conv BN scales into the conv weights (trace-time, tiny).
    w1 = params['w1'][:, :, 0, 0].T * s2[None, :]            # (Cin, Cb)
    w2 = jnp.transpose(params['w2'], (2, 3, 1, 0))            # (3, 3, Cb, Cb)
    w3 = params['w3'][:, :, 0, 0].T * s4[None, :]             # (Cb, Cout)

    x = jnp.transpose(x_nchw, (0, 2, 3, 1))                   # NCHW -> NHWC
    x2d = x.reshape(N * H * W, Cin)

    # stage 1: relu(bn2(conv1(relu?(bn1(x)))))   (one fused, M-tiled kernel)
    a1 = fused_1x1_bn_relu(x2d, w1, s1, b1, b2,
                           pre_relu=not remove_first_relu,
                           compute_dtype=compute_dtype, out_dtype=compute_dtype,
                           tile_rows=tile_rows)
    a1 = a1.reshape(N, H, W, Cb)

    # stage 2: relu(bn3(conv2(a1))), strided output computed directly
    a2 = conv3x3_bn_relu(a1, w2, s3, b3, stride=stride,
                         compute_dtype=compute_dtype, out_dtype=compute_dtype)
    Ho, Wo = a2.shape[1], a2.shape[2]

    # shortcut operand (fused into stage-3 kernel)
    if 'wsc' in params:
        wsc = params['wsc'][:, :, 0, 0].T                     # (Cin, Cout)
        xs = x[:, ::stride, ::stride, :].reshape(N * Ho * Wo, Cin)
    else:
        # PyTorch identity shortcut is only shape-consistent for stride == 1.
        if stride != 1:
            raise ValueError("identity shortcut requires stride == 1")
        wsc = None
        xs = x2d                                              # Cin == Cout

    # stage 3: (bn4?)(conv3(a2)) + shortcut       (one fused, M-tiled kernel)
    y = fused_1x1_residual(a2.reshape(N * Ho * Wo, Cb), w3, b4, xs, wsc,
                           compute_dtype=compute_dtype, out_dtype=jnp.float32,
                           tile_rows=tile_rows)
    y = y.reshape(N, Ho, Wo, Cout)
    return jnp.transpose(y, (0, 3, 1, 2))                     # back to NCHW


# ----------------------------------------------------------------------------
# Deterministic params (PyTorch-shaped weights) + pure-JAX reference
# ----------------------------------------------------------------------------
def init_params(key, c_in, c_out, *, add_last_bn):
    cb = c_out // 4  # expansion = 4
    keys = jax.random.split(key, 8)

    def bn_p(k, c):
        k1, k2, k3, k4 = jax.random.split(k, 4)
        return dict(
            gamma=1.0 + 0.1 * jax.random.normal(k1, (c,), jnp.float32),
            beta=0.1 * jax.random.normal(k2, (c,), jnp.float32),
            mean=0.1 * jax.random.normal(k3, (c,), jnp.float32),
            var=1.0 + 0.1 * jnp.abs(jax.random.normal(k4, (c,), jnp.float32)))

    p = dict(
        bn1=bn_p(keys[0], c_in),
        w1=0.2 * jax.random.normal(keys[1], (cb, c_in, 1, 1), jnp.float32),
        bn2=bn_p(keys[2], cb),
        w2=0.2 * jax.random.normal(keys[3], (cb, cb, 3, 3), jnp.float32),
        bn3=bn_p(keys[4], cb),
        w3=0.2 * jax.random.normal(keys[5], (c_out, cb, 1, 1), jnp.float32),
    )
    if add_last_bn:
        p['bn4'] = bn_p(keys[6], c_out)
    if c_in != c_out:
        p['wsc'] = 0.2 * jax.random.normal(keys[7], (c_out, c_in, 1, 1),
                                           jnp.float32)
    return p


def reference_forward(x, p, *, stride, remove_first_relu, add_last_bn):
    def bn(t, bp):
        scale = bp['gamma'] / jnp.sqrt(bp['var'] + EPS)
        bias = bp['beta'] - bp['mean'] * scale
        return t * scale[None, :, None, None] + bias[None, :, None, None]

    def conv(t, w, s=1, pad=0):
        return jax.lax.conv_general_dilated(
            t, w, (s, s), [(pad, pad), (pad, pad)],
            dimension_numbers=('NCHW', 'OIHW', 'NCHW'))

    y = bn(x, p['bn1'])
    if not remove_first_relu:
        y = jnp.maximum(y, 0.0)
    y = conv(y, p['w1'])
    y = jnp.maximum(bn(y, p['bn2']), 0.0)
    y = conv(y, p['w2'], s=stride, pad=1)
    y = jnp.maximum(bn(y, p['bn3']), 0.0)
    y = conv(y, p['w3'])
    if add_last_bn:
        y = bn(y, p['bn4'])
    sc = conv(x, p['wsc'], s=stride) if 'wsc' in p else x
    return y + sc


# ----------------------------------------------------------------------------
if __name__ == "__main__":
    N, C_IN, H, W = 2, 16, 16, 16
    C_OUT, STRIDE = 32, 2
    REMOVE_FIRST_RELU, ADD_LAST_BN = False, True

    key = jax.random.PRNGKey(0)
    kp, kx = jax.random.split(key)
    params = init_params(kp, C_IN, C_OUT, add_last_bn=ADD_LAST_BN)
    x = jax.random.normal(kx, (N, C_IN, H, W), jnp.float32)

    fwd = jax.jit(functools.partial(
        bottleneck_block_forward, stride=STRIDE,
        remove_first_relu=REMOVE_FIRST_RELU, add_last_bn=ADD_LAST_BN))
    y = jax.block_until_ready(fwd(x, params))

    y_ref = reference_forward(x, params, stride=STRIDE,
                              remove_first_relu=REMOVE_FIRST_RELU,
                              add_last_bn=ADD_LAST_BN)
    assert y.shape == y_ref.shape == (N, C_OUT, H // STRIDE, W // STRIDE)
    err = float(jnp.max(jnp.abs(y - y_ref)))
    # bf16 MXU math with f32 accumulation vs. f32 reference
    assert err < 5e-2, f"mismatch vs reference: max abs err {err}"
    print("KERNEL_OK")
</pallas_src>

<mosaic_0001>
module attributes {stable_mosaic.version = 11 : i64} {
  func.func @_stage1_kernel(%arg0: i32, %arg1: memref<512x16xf32, #tpu.memory_space<vmem>>, %arg2: memref<16x8xbf16, #tpu.memory_space<vmem>>, %arg3: memref<1x16xf32, #tpu.memory_space<vmem>>, %arg4: memref<1x16xf32, #tpu.memory_space<vmem>>, %arg5: memref<1x8xf32, #tpu.memory_space<vmem>>, %arg6: memref<512x8xbf16, #tpu.memory_space<vmem>>) attributes {dimension_semantics = [#tpu.dimension_semantics<parallel>], iteration_bounds = array<i64: 1>, scalar_prefetch = 0 : i64, scratch_operands = 0 : i64, tpu.core_type = #tpu.core_type<tc>, window_params = [{transform_indices = @transform_0, window_bounds = array<i64: 512, 16>}, {pipeline_mode = #tpu.pipeline_mode<synchronous>, transform_indices = @transform_1, window_bounds = array<i64: 16, 8>}, {pipeline_mode = #tpu.pipeline_mode<synchronous>, transform_indices = @transform_2, window_bounds = array<i64: 1, 16>}, {pipeline_mode = #tpu.pipeline_mode<synchronous>, transform_indices = @transform_3, window_bounds = array<i64: 1, 16>}, {pipeline_mode = #tpu.pipeline_mode<synchronous>, transform_indices = @transform_4, window_bounds = array<i64: 1, 8>}, {transform_indices = @transform_5, window_bounds = array<i64: 512, 8>}]} {
    %c0 = arith.constant 0 : index
    %c0_0 = arith.constant 0 : index
    %0 = vector.load %arg1[%c0, %c0_0] : memref<512x16xf32, #tpu.memory_space<vmem>>, vector<512x16xf32>
    %c0_1 = arith.constant 0 : index
    %c0_2 = arith.constant 0 : index
    %1 = vector.load %arg3[%c0_1, %c0_2] : memref<1x16xf32, #tpu.memory_space<vmem>>, vector<1x16xf32>
    %2 = vector.broadcast %1 : vector<1x16xf32> to vector<512x16xf32>
    %3 = arith.mulf %0, %2 : vector<512x16xf32>
    %c0_3 = arith.constant 0 : index
    %c0_4 = arith.constant 0 : index
    %4 = vector.load %arg4[%c0_3, %c0_4] : memref<1x16xf32, #tpu.memory_space<vmem>>, vector<1x16xf32>
    %5 = vector.broadcast %4 : vector<1x16xf32> to vector<512x16xf32>
    %6 = arith.addf %3, %5 : vector<512x16xf32>
    %cst = arith.constant 0.000000e+00 : f32
    %7 = vector.broadcast %cst : f32 to vector<512x16xf32>
    %8 = arith.maximumf %6, %7 : vector<512x16xf32>
    %9 = arith.truncf %8 : vector<512x16xf32> to vector<512x16xbf16>
    %c0_5 = arith.constant 0 : index
    %c0_6 = arith.constant 0 : index
    %10 = vector.load %arg2[%c0_5, %c0_6] : memref<16x8xbf16, #tpu.memory_space<vmem>>, vector<16x8xbf16>
    %cst_7 = arith.constant dense<0.000000e+00> : vector<512x8xf32>
    %11 = tpu.matmul %9, %10, %cst_7 {dimension_numbers = #tpu.dot_dimension_numbers<[1], [0], [0], [1], [0, 0, 1, 1], [], []>} : vector<512x16xbf16>, vector<16x8xbf16>, vector<512x8xf32> -> vector<512x8xf32>
    %c0_8 = arith.constant 0 : index
    %c0_9 = arith.constant 0 : index
    %12 = vector.load %arg5[%c0_8, %c0_9] : memref<1x8xf32, #tpu.memory_space<vmem>>, vector<1x8xf32>
    %13 = vector.broadcast %12 : vector<1x8xf32> to vector<512x8xf32>
    %14 = arith.addf %11, %13 : vector<512x8xf32>
    %cst_10 = arith.constant 0.000000e+00 : f32
    %15 = vector.broadcast %cst_10 : f32 to vector<512x8xf32>
    %16 = arith.maximumf %14, %15 : vector<512x8xf32>
    %17 = arith.truncf %16 : vector<512x8xf32> to vector<512x8xbf16>
    %c0_11 = arith.constant 0 : index
    %c0_12 = arith.constant 0 : index
    %18 = vector.load %arg6[%c0_11, %c0_12] : memref<512x8xbf16, #tpu.memory_space<vmem>>, vector<512x8xbf16>
    tpu.vector_store %arg6[%c0_11, %c0_12], %17 {strides = array<i32>} : memref<512x8xbf16, #tpu.memory_space<vmem>>, vector<512x8xbf16>,
    return
  }
  func.func @transform_0(%arg0: i32) -> (i32, i32) {
    %c0_i32 = arith.constant 0 : i32
    %c0_i32_0 = arith.constant 0 : i32
    return %arg0, %c0_i32 : i32, i32
  }
  func.func @transform_1(%arg0: i32) -> (i32, i32) {
    %c0_i32 = arith.constant 0 : i32
    %c0_i32_0 = arith.constant 0 : i32
    %c0_i32_1 = arith.constant 0 : i32
    return %c0_i32, %c0_i32_0 : i32, i32
  }
  func.func @transform_2(%arg0: i32) -> (i32, i32) {
    %c0_i32 = arith.constant 0 : i32
    %c0_i32_0 = arith.constant 0 : i32
    %c0_i32_1 = arith.constant 0 : i32
    return %c0_i32, %c0_i32_0 : i32, i32
  }
  func.func @transform_3(%arg0: i32) -> (i32, i32) {
    %c0_i32 = arith.constant 0 : i32
    %c0_i32_0 = arith.constant 0 : i32
    %c0_i32_1 = arith.constant 0 : i32
    return %c0_i32, %c0_i32_0 : i32, i32
  }
  func.func @transform_4(%arg0: i32) -> (i32, i32) {
    %c0_i32 = arith.constant 0 : i32
    %c0_i32_0 = arith.constant 0 : i32
    %c0_i32_1 = arith.constant 0 : i32
    return %c0_i32, %c0_i32_0 : i32, i32
  }
  func.func @transform_5(%arg0: i32) -> (i32, i32) {
    %c0_i32 = arith.constant 0 : i32
    %c0_i32_0 = arith.constant 0 : i32
    return %arg0, %c0_i32 : i32, i32
  }
}

module attributes {stable_mosaic.version = 11 : i64} {
  func.func @_conv3x3_kernel(%arg0: i32, %arg1: i32, %arg2: memref<1x1x9x16xbf16, #tpu.memory_space<vmem>>, %arg3: memref<1x1x9x16xbf16, #tpu.memory_space<vmem>>, %arg4: memref<1x1x9x16xbf16, #tpu.memory_space<vmem>>, %arg5: memref<96x8xbf16, #tpu.memory_space<vmem>>, %arg6: memref<1x8xf32, #tpu.memory_space<vmem>>, %arg7: memref<1x1x8x8xbf16, #tpu.memory_space<vmem>>) attributes {dimension_semantics = [#tpu.dimension_semantics<parallel>, #tpu.dimension_semantics<parallel>], iteration_bounds = array<i64: 2, 8>, scalar_prefetch = 0 : i64, scratch_operands = 0 : i64, tpu.core_type = #tpu.core_type<tc>, window_params = [{transform_indices = @transform_0, window_bounds = array<i64: 1, 1, 9, 16>}, {transform_indices = @transform_1, window_bounds = array<i64: 1, 1, 9, 16>}, {transform_indices = @transform_2, window_bounds = array<i64: 1, 1, 9, 16>}, {pipeline_mode = #tpu.pipeline_mode<synchronous>, transform_indices = @transform_3, window_bounds = array<i64: 96, 8>}, {pipeline_mode = #tpu.pipeline_mode<synchronous>, transform_indices = @transform_4, window_bounds = array<i64: 1, 8>}, {transform_indices = @transform_5, window_bounds = array<i64: 1, 1, 8, 8>}]} {
    %c0 = arith.constant 0 : index
    %c0_0 = arith.constant 0 : index
    %c0_1 = arith.constant 0 : index
    %c0_2 = arith.constant 0 : index
    %0 = vector.load %arg2[%c0, %c0_0, %c0_1, %c0_2] : memref<1x1x9x16xbf16, #tpu.memory_space<vmem>>, vector<1x1x9x16xbf16>
    %1 = vector.shape_cast %0 : vector<1x1x9x16xbf16> to vector<9x16xbf16>
    %2 = vector.extract_strided_slice %1 {offsets = [0, 0], sizes = [8, 16], strides = [1, 1]} : vector<9x16xbf16> to vector<8x16xbf16>
    %3 = vector.extract_strided_slice %1 {offsets = [1, 0], sizes = [8, 16], strides = [1, 1]} : vector<9x16xbf16> to vector<8x16xbf16>
    %c0_3 = arith.constant 0 : index
    %c0_4 = arith.constant 0 : index
    %c0_5 = arith.constant 0 : index
    %c0_6 = arith.constant 0 : index
    %4 = vector.load %arg3[%c0_3, %c0_4, %c0_5, %c0_6] : memref<1x1x9x16xbf16, #tpu.memory_space<vmem>>, vector<1x1x9x16xbf16>
    %5 = vector.shape_cast %4 : vector<1x1x9x16xbf16> to vector<9x16xbf16>
    %6 = vector.extract_strided_slice %5 {offsets = [0, 0], sizes = [8, 16], strides = [1, 1]} : vector<9x16xbf16> to vector<8x16xbf16>
    %7 = vector.extract_strided_slice %5 {offsets = [1, 0], sizes = [8, 16], strides = [1, 1]} : vector<9x16xbf16> to vector<8x16xbf16>
    %c0_7 = arith.constant 0 : index
    %c0_8 = arith.constant 0 : index
    %c0_9 = arith.constant 0 : index
    %c0_10 = arith.constant 0 : index
    %8 = vector.load %arg4[%c0_7, %c0_8, %c0_9, %c0_10] : memref<1x1x9x16xbf16, #tpu.memory_space<vmem>>, vector<1x1x9x16xbf16>
    %9 = vector.shape_cast %8 : vector<1x1x9x16xbf16> to vector<9x16xbf16>
    %10 = vector.extract_strided_slice %9 {offsets = [0, 0], sizes = [8, 16], strides = [1, 1]} : vector<9x16xbf16> to vector<8x16xbf16>
    %11 = vector.extract_strided_slice %9 {offsets = [1, 0], sizes = [8, 16], strides = [1, 1]} : vector<9x16xbf16> to vector<8x16xbf16>
    %12 = tpu.concatenate %2, %3, %6, %7, %10, %11 in 1 : vector<8x16xbf16>, vector<8x16xbf16>, vector<8x16xbf16>, vector<8x16xbf16>, vector<8x16xbf16>, vector<8x16xbf16> -> vector<8x96xbf16>
    %c0_11 = arith.constant 0 : index
    %c0_12 = arith.constant 0 : index
    %13 = vector.load %arg5[%c0_11, %c0_12] : memref<96x8xbf16, #tpu.memory_space<vmem>>, vector<96x8xbf16>
    %cst = arith.constant dense<0.000000e+00> : vector<8x8xf32>
    %14 = tpu.matmul %12, %13, %cst {dimension_numbers = #tpu.dot_dimension_numbers<[1], [0], [0], [1], [0, 0, 1, 1], [], []>} : vector<8x96xbf16>, vector<96x8xbf16>, vector<8x8xf32> -> vector<8x8xf32>
    %c0_13 = arith.constant 0 : index
    %c0_14 = arith.constant 0 : index
    %15 = vector.load %arg6[%c0_13, %c0_14] : memref<1x8xf32, #tpu.memory_space<vmem>>, vector<1x8xf32>
    %16 = vector.broadcast %15 : vector<1x8xf32> to vector<8x8xf32>
    %17 = arith.addf %14, %16 : vector<8x8xf32>
    %cst_15 = arith.constant 0.000000e+00 : f32
    %18 = vector.broadcast %cst_15 : f32 to vector<8x8xf32>
    %19 = arith.maximumf %17, %18 : vector<8x8xf32>
    %20 = arith.truncf %19 : vector<8x8xf32> to vector<8x8xbf16>
    %c0_16 = arith.constant 0 : index
    %c0_17 = arith.constant 0 : index
    %c0_18 = arith.constant 0 : index
    %c0_19 = arith.constant 0 : index
    %21 = vector.load %arg7[%c0_16, %c0_17, %c0_18, %c0_19] : memref<1x1x8x8xbf16, #tpu.memory_space<vmem>>, vector<1x1x8x8xbf16>
    %22 = vector.shape_cast %21 : vector<1x1x8x8xbf16> to vector<8x8xbf16>
    %23 = vector.shape_cast %20 : vector<8x8xbf16> to vector<1x1x8x8xbf16>
    tpu.vector_store %arg7[%c0_16, %c0_17, %c0_18, %c0_19], %23 {strides = array<i32>} : memref<1x1x8x8xbf16, #tpu.memory_space<vmem>>, vector<1x1x8x8xbf16>,
    return
  }
  func.func @transform_0(%arg0: i32, %arg1: i32) -> (i32, i32, i32, i32) {
    %c2_i32 = arith.constant 2 : i32
    %0 = arith.muli %arg1, %c2_i32 : i32
    %c0_i32 = arith.constant 0 : i32
    %1 = arith.addi %0, %c0_i32 : i32
    %c0_i32_0 = arith.constant 0 : i32
    %c0_i32_1 = arith.constant 0 : i32
    %c0_i32_2 = arith.constant 0 : i32
    return %arg0, %1, %c0_i32_0, %c0_i32_1 : i32, i32, i32, i32
  }
  func.func @transform_1(%arg0: i32, %arg1: i32) -> (i32, i32, i32, i32) {
    %c2_i32 = arith.constant 2 : i32
    %0 = arith.muli %arg1, %c2_i32 : i32
    %c1_i32 = arith.constant 1 : i32
    %1 = arith.addi %0, %c1_i32 : i32
    %c0_i32 = arith.constant 0 : i32
    %c0_i32_0 = arith.constant 0 : i32
    %c0_i32_1 = arith.constant 0 : i32
    return %arg0, %1, %c0_i32, %c0_i32_0 : i32, i32, i32, i32
  }
  func.func @transform_2(%arg0: i32, %arg1: i32) -> (i32, i32, i32, i32) {
    %c2_i32 = arith.constant 2 : i32
    %0 = arith.muli %arg1, %c2_i32 : i32
    %c2_i32_0 = arith.constant 2 : i32
    %1 = arith.addi %0, %c2_i32_0 : i32
    %c0_i32 = arith.constant 0 : i32
    %c0_i32_1 = arith.constant 0 : i32
    %c0_i32_2 = arith.constant 0 : i32
    return %arg0, %1, %c0_i32, %c0_i32_1 : i32, i32, i32, i32
  }
  func.func @transform_3(%arg0: i32, %arg1: i32) -> (i32, i32) {
    %c0_i32 = arith.constant 0 : i32
    %c0_i32_0 = arith.constant 0 : i32
    %c0_i32_1 = arith.constant 0 : i32
    return %c0_i32, %c0_i32_0 : i32, i32
  }
  func.func @transform_4(%arg0: i32, %arg1: i32) -> (i32, i32) {
    %c0_i32 = arith.constant 0 : i32
    %c0_i32_0 = arith.constant 0 : i32
    %c0_i32_1 = arith.constant 0 : i32
    return %c0_i32, %c0_i32_0 : i32, i32
  }
  func.func @transform_5(%arg0: i32, %arg1: i32) -> (i32, i32, i32, i32) {
    %c0_i32 = arith.constant 0 : i32
    %c0_i32_0 = arith.constant 0 : i32
    %c0_i32_1 = arith.constant 0 : i32
    return %arg0, %arg1, %c0_i32, %c0_i32_0 : i32, i32, i32, i32
  }
}

module attributes {stable_mosaic.version = 11 : i64} {
  func.func @_stage3_kernel(%arg0: i32, %arg1: memref<128x8xbf16, #tpu.memory_space<vmem>>, %arg2: memref<8x32xbf16, #tpu.memory_space<vmem>>, %arg3: memref<1x32xf32, #tpu.memory_space<vmem>>, %arg4: memref<128x16xf32, #tpu.memory_space<vmem>>, %arg5: memref<16x32xbf16, #tpu.memory_space<vmem>>, %arg6: memref<128x32xf32, #tpu.memory_space<vmem>>) attributes {dimension_semantics = [#tpu.dimension_semantics<parallel>], iteration_bounds = array<i64: 1>, scalar_prefetch = 0 : i64, scratch_operands = 0 : i64, tpu.core_type = #tpu.core_type<tc>, window_params = [{transform_indices = @transform_0, window_bounds = array<i64: 128, 8>}, {pipeline_mode = #tpu.pipeline_mode<synchronous>, transform_indices = @transform_1, window_bounds = array<i64: 8, 32>}, {pipeline_mode = #tpu.pipeline_mode<synchronous>, transform_indices = @transform_2, window_bounds = array<i64: 1, 32>}, {transform_indices = @transform_3, window_bounds = array<i64: 128, 16>}, {pipeline_mode = #tpu.pipeline_mode<synchronous>, transform_indices = @transform_4, window_bounds = array<i64: 16, 32>}, {transform_indices = @transform_5, window_bounds = array<i64: 128, 32>}]} {
    %c0 = arith.constant 0 : index
    %c0_0 = arith.constant 0 : index
    %0 = vector.load %arg1[%c0, %c0_0] : memref<128x8xbf16, #tpu.memory_space<vmem>>, vector<128x8xbf16>
    %c0_1 = arith.constant 0 : index
    %c0_2 = arith.constant 0 : index
    %1 = vector.load %arg2[%c0_1, %c0_2] : memref<8x32xbf16, #tpu.memory_space<vmem>>, vector<8x32xbf16>
    %cst = arith.constant dense<0.000000e+00> : vector<128x32xf32>
    %2 = tpu.matmul %0, %1, %cst {dimension_numbers = #tpu.dot_dimension_numbers<[1], [0], [0], [1], [0, 0, 1, 1], [], []>} : vector<128x8xbf16>, vector<8x32xbf16>, vector<128x32xf32> -> vector<128x32xf32>
    %c0_3 = arith.constant 0 : index
    %c0_4 = arith.constant 0 : index
    %3 = vector.load %arg3[%c0_3, %c0_4] : memref<1x32xf32, #tpu.memory_space<vmem>>, vector<1x32xf32>
    %4 = vector.broadcast %3 : vector<1x32xf32> to vector<128x32xf32>
    %5 = arith.addf %2, %4 : vector<128x32xf32>
    %c0_5 = arith.constant 0 : index
    %c0_6 = arith.constant 0 : index
    %6 = vector.load %arg4[%c0_5, %c0_6] : memref<128x16xf32, #tpu.memory_space<vmem>>, vector<128x16xf32>
    %7 = arith.truncf %6 : vector<128x16xf32> to vector<128x16xbf16>
    %c0_7 = arith.constant 0 : index
    %c0_8 = arith.constant 0 : index
    %8 = vector.load %arg5[%c0_7, %c0_8] : memref<16x32xbf16, #tpu.memory_space<vmem>>, vector<16x32xbf16>
    %cst_9 = arith.constant dense<0.000000e+00> : vector<128x32xf32>
    %9 = tpu.matmul %7, %8, %cst_9 {dimension_numbers = #tpu.dot_dimension_numbers<[1], [0], [0], [1], [0, 0, 1, 1], [], []>} : vector<128x16xbf16>, vector<16x32xbf16>, vector<128x32xf32> -> vector<128x32xf32>
    %10 = arith.addf %5, %9 : vector<128x32xf32>
    %c0_10 = arith.constant 0 : index
    %c0_11 = arith.constant 0 : index
    %11 = vector.load %arg6[%c0_10, %c0_11] : memref<128x32xf32, #tpu.memory_space<vmem>>, vector<128x32xf32>
    tpu.vector_store %arg6[%c0_10, %c0_11], %10 {strides = array<i32>} : memref<128x32xf32, #tpu.memory_space<vmem>>, vector<128x32xf32>,
    return
  }
  func.func @transform_0(%arg0: i32) -> (i32, i32) {
    %c0_i32 = arith.constant 0 : i32
    %c0_i32_0 = arith.constant 0 : i32
    return %arg0, %c0_i32 : i32, i32
  }
  func.func @transform_1(%arg0: i32) -> (i32, i32) {
    %c0_i32 = arith.constant 0 : i32
    %c0_i32_0 = arith.constant 0 : i32
    %c0_i32_1 = arith.constant 0 : i32
    return %c0_i32, %c0_i32_0 : i32, i32
  }
  func.func @transform_2(%arg0: i32) -> (i32, i32) {
    %c0_i32 = arith.constant 0 : i32
    %c0_i32_0 = arith.constant 0 : i32
    %c0_i32_1 = arith.constant 0 : i32
    return %c0_i32, %c0_i32_0 : i32, i32
  }
  func.func @transform_3(%arg0: i32) -> (i32, i32) {
    %c0_i32 = arith.constant 0 : i32
    %c0_i32_0 = arith.constant 0 : i32
    return %arg0, %c0_i32 : i32, i32
  }
  func.func @transform_4(%arg0: i32) -> (i32, i32) {
    %c0_i32 = arith.constant 0 : i32
    %c0_i32_0 = arith.constant 0 : i32
    %c0_i32_1 = arith.constant 0 : i32
    return %c0_i32, %c0_i32_0 : i32, i32
  }
  func.func @transform_5(%arg0: i32) -> (i32, i32) {
    %c0_i32 = arith.constant 0 : i32
    %c0_i32_0 = arith.constant 0 : i32
    return %arg0, %c0_i32 : i32, i32
  }
}

</mosaic_0001>

<bundles_post_ra>
// kernel: bottleneck_block_forward.3
= control target key start
LH: loop header
LB: loop body
LE: loop exit
PB: predicated region body
PF: predicated region fallthrough
CT: control target
= control target key end

     0   :  { %vm329_vm0 = vcmask 130048   ;;  %vm723_vm1 = vcmask 60416   ;;  %s1555_s1 = inlined_call_operand.vmem [shape: bf16[16,8], index: 1, kind: input, shape index: {}]   ;;  %s1556_s0 = inlined_call_operand.vmem [shape: f32[512,16], index: 0, kind: input, shape index: {}]   ;;  %s1557_s2 = inlined_call_operand.vmem [shape: f32[1,16], index: 2, kind: input, shape index: {}]   ;;  %s1558_s3 = inlined_call_operand.vmem [shape: f32[1,16], index: 3, kind: input, shape index: {}]   ;;  %s1559_s4 = inlined_call_operand.vmem [shape: f32[1,8], index: 4, kind: input, shape index: {}]   ;;  %s1560_s5 = inlined_call_operand.vmem [shape: bf16[512,8], index: 5, kind: output, shape index: {}]  }
   0x1   :  { %v828_v0 = vld [vmem:[%s1555_s1] sm:$0xff]  ;;  %v22_v2 = vld [vmem:[%s1556_s0 + $0x8] sm:$0xff]  ;;  %v23_v30 = vld [vmem:[%s1556_s0 + $0x10] sm:$0xff] }
   0x2   :  { %v21_v1 = vld [vmem:[%s1556_s0] sm:$0xff]  ;;  %433 = vmatpush.bf16.msra.mxu0 %v828_v0  ;;  %829 = vmatpush.bf16.msra.mxu1 %v828_v0  ;;  %v38_v6 = vld [vmem:[%s1556_s0 + $0x88] sm:$0xff]  ;;  %v24_v35 = vld [vmem:[%s1556_s0 + $0x18] sm:$0xff] }
   0x3   :  { %v877_v3 = vld [vmem:[%s1557_s2] ss:$0 sm:$0xff]  ;;  %830 = vmatpush.bf16.msra.mxu2 %v828_v0  ;;  %831 = vmatpush.bf16.msra.mxu3 %v828_v0  ;;  %v54_v11 = vld [vmem:[%s1556_s0 + $0x108] sm:$0xff]  ;;  %v39_v36 = vld [vmem:[%s1556_s0 + $0x90] sm:$0xff] }
   0x4   :  { %v882_v4 = vld [vmem:[%s1558_s3] ss:$0 sm:$0xff]  ;;  %v89_v7 = vmul.f32 %v877_v3, %v21_v1  ;;  %v90_v8 = vmul.f32 %v877_v3, %v22_v2  ;;  %v106_v13 = vmul.f32 %v877_v3, %v38_v6  ;;  %v122_v15 = vmul.f32 %v877_v3, %v54_v11  ;;  %v70_v16 = vld [vmem:[%s1556_s0 + $0x188] sm:$0xff]  ;;  %v40_v39 = vld [vmem:[%s1556_s0 + $0x98] sm:$0xff] }
   0x5   :  { %v37_v5 = vld [vmem:[%s1556_s0 + $0x80] sm:$0xff]  ;;  %v138_v21 = vmul.f32 %v877_v3, %v70_v16  ;;  %v55_v40 = vld [vmem:[%s1556_s0 + $0x110] sm:$0xff]  ;;  %v56_v41 = vld [vmem:[%s1556_s0 + $0x118] sm:$0xff]  ;;  %v91_v46 = vmul.f32 %v877_v3, %v23_v30  ;;  %v92_v47 = vmul.f32 %v877_v3, %v24_v35  ;;  %v107_v48 = vmul.f32 %v877_v3, %v39_v36 }
   0x6   :  { %v105_v9 = vmul.f32 %v877_v3, %v37_v5  ;;  %v53_v10 = vld [vmem:[%s1556_s0 + $0x100] sm:$0xff]  ;;  %v157_v18 = vadd.f32 %v882_v4, %v89_v7  ;;  %v158_v19 = vadd.f32 %v882_v4, %v90_v8  ;;  %v174_v22 = vadd.f32 %v882_v4, %v106_v13  ;;  %v71_v44 = vld [vmem:[%s1556_s0 + $0x190] sm:$0xff]  ;;  %v72_v49 = vld [vmem:[%s1556_s0 + $0x198] sm:$0xff] }
   0x7   :  { %v69_v12 = vld [vmem:[%s1556_s0 + $0x180] sm:$0xff]  ;;  %v121_v14 = vmul.f32 %v877_v3, %v53_v10  ;;  %v190_v24 = vadd.f32 %v882_v4, %v122_v15  ;;  %v206_v29 = vadd.f32 %v882_v4, %v138_v21  ;;  %v108_v50 = vmul.f32 %v877_v3, %v40_v39  ;;  %v26_v13 = vld [vmem:[%s1556_s0 + $0x28] sm:$0xff] }
   0x8   :  { %v137_v17 = vmul.f32 %v877_v3, %v69_v12  ;;  %v173_v20 = vadd.f32 %v882_v4, %v105_v9  ;;  %v221_v26 = vmax.f32 %v157_v18, 0.0  ;;  %v222_v27 = vmax.f32 %v158_v19, 0.0  ;;  %v25_v12 = vld [vmem:[%s1556_s0 + $0x20] sm:$0xff]  ;;  %v42_v16 = vld [vmem:[%s1556_s0 + $0xa8] sm:$0xff] }
   0x9   :  { %v189_v23 = vadd.f32 %v882_v4, %v121_v14  ;;  %v238_v31 = vmax.f32 %v174_v22, 0.0  ;;  %v254_v33 = vmax.f32 %v190_v24, 0.0  ;;  %v270_v38 = vmax.f32 %v206_v29, 0.0  ;;  %v41_v14 = vld [vmem:[%s1556_s0 + $0xa0] sm:$0xff]  ;;  %v58_v18 = vld [vmem:[%s1556_s0 + $0x128] sm:$0xff] }
   0xa   :  { %v205_v25 = vadd.f32 %v882_v4, %v137_v17  ;;  %v237_v28 = vmax.f32 %v173_v20, 0.0  ;;  %v285_v37 = vpack.c.bf16 %v222_v27, %v221_v26  ;;  %v123_v51 = vmul.f32 %v877_v3, %v55_v40  ;;  %v57_v17 = vld [vmem:[%s1556_s0 + $0x120] sm:$0xff]  ;;  %v74_v20 = vld [vmem:[%s1556_s0 + $0x1a8] sm:$0xff] }
   0xb   :  { %v253_v32 = vmax.f32 %v189_v23, 0.0  ;;  %v124_v52 = vmul.f32 %v877_v3, %v56_v41  ;;  %v139_v53 = vmul.f32 %v877_v3, %v71_v44  ;;  %v140_v54 = vmul.f32 %v877_v3, %v72_v49  ;;  %v73_v19 = vld [vmem:[%s1556_s0 + $0x1a0] sm:$0xff]  ;;  %v28_v49 = vld [vmem:[%s1556_s0 + $0x38] sm:$0xff] }
   0xc   :  { %v269_v34 = vmax.f32 %v205_v25, 0.0  ;;  %v293_v42 = vpack.c.bf16 %v238_v31, %v237_v28  ;;  %796 = vmatmul.msk.bf16.vlgmr.msra.gmra.mxu0 %vm329_vm0, %v285_v37  ;;  %v159_v55 = vadd.f32 %v882_v4, %v91_v46  ;;  %v160_v56 = vadd.f32 %v882_v4, %v92_v47 }
   0xd   :  { %v301_v43 = vpack.c.bf16 %v254_v33, %v253_v32  ;;  %v175_v57 = vadd.f32 %v882_v4, %v107_v48  ;;  %v176_v58 = vadd.f32 %v882_v4, %v108_v50  ;;  %v191_v59 = vadd.f32 %v882_v4, %v123_v51  ;;  %v27_v48 = vld [vmem:[%s1556_s0 + $0x30] sm:$0xff] }
   0xe   :  { %v309_v45 = vpack.c.bf16 %v270_v38, %v269_v34  ;;  %804 = vmatmul.msk.bf16.vlgmr.msra.gmra.mxu1 %vm329_vm0, %v293_v42  ;;  %v192_v60 = vadd.f32 %v882_v4, %v124_v52  ;;  %v207_v61 = vadd.f32 %v882_v4, %v139_v53  ;;  %v208_v62 = vadd.f32 %v882_v4, %v140_v54  ;;  %v43_v50 = vld [vmem:[%s1556_s0 + $0xb0] sm:$0xff]  ;;  %v44_v52 = vld [vmem:[%s1556_s0 + $0xb8] sm:$0xff] }
   0xf   :  { %812 = vmatmul.msk.bf16.vlgmr.msra.gmra.mxu2 %vm329_vm0, %v301_v43  ;;  %v223_v63 = vmax.f32 %v159_v55, 0.0  ;;  %v224_v0 = vmax.f32 %v160_v56, 0.0  ;;  %v239_v1 = vmax.f32 %v175_v57, 0.0  ;;  %v240_v2 = vmax.f32 %v176_v58, 0.0  ;;  %v59_v53 = vld [vmem:[%s1556_s0 + $0x130] sm:$0xff]  ;;  %v60_v54 = vld [vmem:[%s1556_s0 + $0x138] sm:$0xff] }
  0x10   :  { %820 = vmatmul.msk.bf16.vlgmr.msra.gmra.mxu3 %vm329_vm0, %v309_v45  ;;  %v255_v5 = vmax.f32 %v191_v59, 0.0  ;;  %v256_v6 = vmax.f32 %v192_v60, 0.0  ;;  %v271_v7 = vmax.f32 %v207_v61, 0.0  ;;  %v272_v8 = vmax.f32 %v208_v62, 0.0  ;;  %v75_v55 = vld [vmem:[%s1556_s0 + $0x1b0] sm:$0xff]  ;;  %v76_v56 = vld [vmem:[%s1556_s0 + $0x1b8] sm:$0xff] }
  0x11   :  { %v286_v9 = vpack.c.bf16 %v224_v0, %v223_v63  ;;  %v294_v10 = vpack.c.bf16 %v240_v2, %v239_v1  ;;  %v93_v21 = vmul.f32 %v877_v3, %v25_v12  ;;  %v94_v22 = vmul.f32 %v877_v3, %v26_v13 }
  0x12   :  { %v302_v11 = vpack.c.bf16 %v256_v6, %v255_v5  ;;  %v310_v15 = vpack.c.bf16 %v272_v8, %v271_v7  ;;  %v109_v23 = vmul.f32 %v877_v3, %v41_v14  ;;  %v110_v24 = vmul.f32 %v877_v3, %v42_v16 }
  0x13   :  { %v125_v25 = vmul.f32 %v877_v3, %v57_v17  ;;  %v126_v26 = vmul.f32 %v877_v3, %v58_v18  ;;  %v141_v27 = vmul.f32 %v877_v3, %v73_v19  ;;  %v142_v28 = vmul.f32 %v877_v3, %v74_v20 }
  0x14   :  { %v161_v29 = vadd.f32 %v882_v4, %v93_v21  ;;  %v162_v30 = vadd.f32 %v882_v4, %v94_v22  ;;  %v177_v31 = vadd.f32 %v882_v4, %v109_v23  ;;  %v178_v32 = vadd.f32 %v882_v4, %v110_v24  ;;  %v29_v22 = vld [vmem:[%s1556_s0 + $0x40] sm:$0xff]  ;;  %v30_v23 = vld [vmem:[%s1556_s0 + $0x48] sm:$0xff] }
  0x15   :  { %v193_v33 = vadd.f32 %v882_v4, %v125_v25  ;;  %v194_v34 = vadd.f32 %v882_v4, %v126_v26  ;;  %v209_v35 = vadd.f32 %v882_v4, %v141_v27  ;;  %v210_v36 = vadd.f32 %v882_v4, %v142_v28  ;;  %v45_v24 = vld [vmem:[%s1556_s0 + $0xc0] sm:$0xff]  ;;  %v46_v26 = vld [vmem:[%s1556_s0 + $0xc8] sm:$0xff] }
  0x16   :  { %v225_v37 = vmax.f32 %v161_v29, 0.0  ;;  %v226_v38 = vmax.f32 %v162_v30, 0.0  ;;  %v241_v39 = vmax.f32 %v177_v31, 0.0  ;;  %v242_v40 = vmax.f32 %v178_v32, 0.0  ;;  %v61_v27 = vld [vmem:[%s1556_s0 + $0x140] sm:$0xff]  ;;  %v62_v28 = vld [vmem:[%s1556_s0 + $0x148] sm:$0xff] }
  0x17   :  { %v257_v41 = vmax.f32 %v193_v33, 0.0  ;;  %v258_v42 = vmax.f32 %v194_v34, 0.0  ;;  %v273_v43 = vmax.f32 %v209_v35, 0.0  ;;  %v274_v44 = vmax.f32 %v210_v36, 0.0  ;;  %v77_v29 = vld [vmem:[%s1556_s0 + $0x1c0] sm:$0xff]  ;;  %v78_v30 = vld [vmem:[%s1556_s0 + $0x1c8] sm:$0xff] }
  0x18   :  { %v287_v45 = vpack.c.bf16 %v226_v38, %v225_v37  ;;  %v295_v46 = vpack.c.bf16 %v242_v40, %v241_v39  ;;  %v95_v57 = vmul.f32 %v877_v3, %v27_v48  ;;  %v96_v58 = vmul.f32 %v877_v3, %v28_v49 }
  0x19   :  { %v303_v47 = vpack.c.bf16 %v258_v42, %v257_v41  ;;  %v311_v51 = vpack.c.bf16 %v274_v44, %v273_v43  ;;  %v111_v59 = vmul.f32 %v877_v3, %v43_v50  ;;  %v112_v60 = vmul.f32 %v877_v3, %v44_v52 }
  0x1a   :  { %v127_v61 = vmul.f32 %v877_v3, %v59_v53  ;;  %v128_v62 = vmul.f32 %v877_v3, %v60_v54  ;;  %v143_v63 = vmul.f32 %v877_v3, %v75_v55  ;;  %v144_v0 = vmul.f32 %v877_v3, %v76_v56 }
  0x1b   :  { %v163_v1 = vadd.f32 %v882_v4, %v95_v57  ;;  %v164_v2 = vadd.f32 %v882_v4, %v96_v58  ;;  %v179_v5 = vadd.f32 %v882_v4, %v111_v59  ;;  %v180_v6 = vadd.f32 %v882_v4, %v112_v60  ;;  %v31_v58 = vld [vmem:[%s1556_s0 + $0x50] sm:$0xff]  ;;  %v32_v59 = vld [vmem:[%s1556_s0 + $0x58] sm:$0xff] }
  0x1c   :  { %797 = vmatmul.msk.bf16.gmra.mxu0 %vm329_vm0, %v286_v9  ;;  %v195_v7 = vadd.f32 %v882_v4, %v127_v61  ;;  %v196_v8 = vadd.f32 %v882_v4, %v128_v62  ;;  %v211_v9 = vadd.f32 %v882_v4, %v143_v63  ;;  %v97_v31 = vmul.f32 %v877_v3, %v29_v22  ;;  %v47_v60 = vld [vmem:[%s1556_s0 + $0xd0] sm:$0xff]  ;;  %v48_v62 = vld [vmem:[%s1556_s0 + $0xd8] sm:$0xff] }
  0x1d   :  { %v228_v12 = vmax.f32 %v164_v2, 0.0  ;;  %v243_v13 = vmax.f32 %v179_v5, 0.0  ;;  %v244_v14 = vmax.f32 %v180_v6, 0.0  ;;  %v98_v32 = vmul.f32 %v877_v3, %v30_v23  ;;  %v63_v63 = vld [vmem:[%s1556_s0 + $0x150] sm:$0xff]  ;;  %v80_v2 = vld [vmem:[%s1556_s0 + $0x1d8] sm:$0xff] }
  0x1e   :  { %805 = vmatmul.msk.bf16.gmra.mxu1 %vm329_vm0, %v294_v10  ;;  %v212_v10 = vadd.f32 %v882_v4, %v144_v0  ;;  %v260_v16 = vmax.f32 %v196_v8, 0.0  ;;  %v275_v17 = vmax.f32 %v211_v9, 0.0  ;;  %v113_v33 = vmul.f32 %v877_v3, %v45_v24  ;;  %v64_v0 = vld [vmem:[%s1556_s0 + $0x158] sm:$0xff] }
  0x1f   :  { %813 = vmatmul.msk.bf16.gmra.mxu2 %vm329_vm0, %v302_v11  ;;  %v227_v11 = vmax.f32 %v163_v1, 0.0  ;;  %v296_v20 = vpack.c.bf16 %v244_v14, %v243_v13  ;;  %v114_v34 = vmul.f32 %v877_v3, %v46_v26  ;;  %v129_v35 = vmul.f32 %v877_v3, %v61_v27  ;;  %v79_v1 = vld [vmem:[%s1556_s0 + $0x1d0] sm:$0xff] }
  0x20   :  { %821 = vmatmul.msk.bf16.gmra.mxu3 %vm329_vm0, %v310_v15  ;;  %v259_v15 = vmax.f32 %v195_v7, 0.0  ;;  %v276_v18 = vmax.f32 %v212_v10, 0.0  ;;  %v130_v36 = vmul.f32 %v877_v3, %v62_v28  ;;  %v145_v37 = vmul.f32 %v877_v3, %v77_v29 }
  0x21   :  { %v288_v19 = vpack.c.bf16 %v228_v12, %v227_v11  ;;  %v146_v38 = vmul.f32 %v877_v3, %v78_v30  ;;  %v165_v39 = vadd.f32 %v882_v4, %v97_v31  ;;  %v166_v40 = vadd.f32 %v882_v4, %v98_v32  ;;  %v33_v32 = vld [vmem:[%s1556_s0 + $0x60] sm:$0xff] }
  0x22   :  { %v304_v21 = vpack.c.bf16 %v260_v16, %v259_v15  ;;  %v312_v25 = vpack.c.bf16 %v276_v18, %v275_v17  ;;  %v181_v41 = vadd.f32 %v882_v4, %v113_v33  ;;  %v182_v42 = vadd.f32 %v882_v4, %v114_v34  ;;  %v34_v33 = vld [vmem:[%s1556_s0 + $0x68] sm:$0xff]  ;;  %v49_v34 = vld [vmem:[%s1556_s0 + $0xe0] sm:$0xff] }
  0x23   :  { %v197_v43 = vadd.f32 %v882_v4, %v129_v35  ;;  %v198_v44 = vadd.f32 %v882_v4, %v130_v36  ;;  %v230_v48 = vmax.f32 %v166_v40, 0.0  ;;  %v99_v5 = vmul.f32 %v877_v3, %v31_v58  ;;  %v50_v36 = vld [vmem:[%s1556_s0 + $0xe8] sm:$0xff] }
  0x24   :  { %v245_v49 = vmax.f32 %v181_v41, 0.0  ;;  %v246_v50 = vmax.f32 %v182_v42, 0.0  ;;  %v100_v6 = vmul.f32 %v877_v3, %v32_v59  ;;  %v115_v7 = vmul.f32 %v877_v3, %v47_v60  ;;  %v82_v40 = vld [vmem:[%s1556_s0 + $0x1e8] sm:$0xff] }
  0x25   :  { %v262_v52 = vmax.f32 %v198_v44, 0.0  ;;  %v116_v8 = vmul.f32 %v877_v3, %v48_v62  ;;  %v131_v9 = vmul.f32 %v877_v3, %v63_v63  ;;  %v132_v10 = vmul.f32 %v877_v3, %v64_v0 }
  0x26   :  { %v297_v56 = vpack.c.bf16 %v246_v50, %v245_v49  ;;  %v147_v11 = vmul.f32 %v877_v3, %v79_v1  ;;  %v148_v12 = vmul.f32 %v877_v3, %v80_v2  ;;  %v167_v13 = vadd.f32 %v882_v4, %v99_v5 }
  0x27   :  { %v168_v14 = vadd.f32 %v882_v4, %v100_v6  ;;  %v183_v15 = vadd.f32 %v882_v4, %v115_v7  ;;  %v184_v16 = vadd.f32 %v882_v4, %v116_v8  ;;  %v199_v17 = vadd.f32 %v882_v4, %v131_v9  ;;  %v35_v6 = vld [vmem:[%s1556_s0 + $0x70] sm:$0xff]  ;;  %v36_v7 = vld [vmem:[%s1556_s0 + $0x78] sm:$0xff] }
  0x28   :  { %v200_v18 = vadd.f32 %v882_v4, %v132_v10  ;;  %v101_v41 = vmul.f32 %v877_v3, %v33_v32  ;;  %v102_v42 = vmul.f32 %v877_v3, %v34_v33  ;;  %v118_v44 = vmul.f32 %v877_v3, %v50_v36  ;;  %v51_v8 = vld [vmem:[%s1556_s0 + $0xf0] sm:$0xff]  ;;  %v52_v10 = vld [vmem:[%s1556_s0 + $0xf8] sm:$0xff] }
  0x29   :  { %v232_v22 = vmax.f32 %v168_v14, 0.0  ;;  %v247_v23 = vmax.f32 %v183_v15, 0.0  ;;  %v248_v24 = vmax.f32 %v184_v16, 0.0  ;;  %v84_v14 = vld [vmem:[%s1556_s0 + $0x1f8] sm:$0xff]  ;;  %v103_v15 = vmul.f32 %v877_v3, %v35_v6 }
  0x2a   :  { %v264_v26 = vmax.f32 %v200_v18, 0.0  ;;  %v169_v49 = vadd.f32 %v882_v4, %v101_v41  ;;  %v170_v50 = vadd.f32 %v882_v4, %v102_v42  ;;  %v104_v16 = vmul.f32 %v877_v3, %v36_v7 }
  0x2b   :  { %v298_v30 = vpack.c.bf16 %v248_v24, %v247_v23  ;;  %v120_v18 = vmul.f32 %v877_v3, %v52_v10  ;;  %v171_v23 = vadd.f32 %v882_v4, %v103_v15 }
  0x2c   :  { %798 = vmatmul.msk.bf16.gmra.mxu0 %vm329_vm0, %v287_v45  ;;  %v213_v45 = vadd.f32 %v882_v4, %v145_v37  ;;  %v65_v37 = vld [vmem:[%s1556_s0 + $0x160] sm:$0xff]  ;;  %v234_v58 = vmax.f32 %v170_v50, 0.0  ;;  %v172_v24 = vadd.f32 %v882_v4, %v104_v16 }
  0x2e   :  { %806 = vmatmul.msk.bf16.gmra.mxu1 %vm329_vm0, %v295_v46  ;;  %v214_v46 = vadd.f32 %v882_v4, %v146_v38  ;;  %v277_v53 = vmax.f32 %v213_v45, 0.0  ;;  %v66_v38 = vld [vmem:[%s1556_s0 + $0x168] sm:$0xff]  ;;  %v133_v45 = vmul.f32 %v877_v3, %v65_v37  ;;  %v236_v32 = vmax.f32 %v172_v24, 0.0 }
  0x2f   :  { %814 = vmatmul.msk.bf16.gmra.mxu2 %vm329_vm0, %v303_v47  ;;  %v229_v47 = vmax.f32 %v165_v39, 0.0  ;;  %v81_v39 = vld [vmem:[%s1556_s0 + $0x1e0] sm:$0xff] }
  0x30   :  { %822 = vmatmul.msk.bf16.gmra.mxu3 %vm329_vm0, %v311_v51  ;;  %v261_v51 = vmax.f32 %v197_v43, 0.0  ;;  %v278_v54 = vmax.f32 %v214_v46, 0.0  ;;  %v117_v43 = vmul.f32 %v877_v3, %v49_v34  ;;  %v134_v46 = vmul.f32 %v877_v3, %v66_v38 }
  0x31   :  { %v289_v55 = vpack.c.bf16 %v230_v48, %v229_v47  ;;  %v149_v47 = vmul.f32 %v877_v3, %v81_v39  ;;  %v150_v48 = vmul.f32 %v877_v3, %v82_v40 }
  0x32   :  { %v305_v57 = vpack.c.bf16 %v262_v52, %v261_v51  ;;  %v313_v61 = vpack.c.bf16 %v278_v54, %v277_v53  ;;  %v185_v51 = vadd.f32 %v882_v4, %v117_v43  ;;  %v186_v52 = vadd.f32 %v882_v4, %v118_v44 }
  0x33   :  { %v201_v53 = vadd.f32 %v882_v4, %v133_v45  ;;  %v202_v54 = vadd.f32 %v882_v4, %v134_v46 }
  0x34   :  { %v249_v59 = vmax.f32 %v185_v51, 0.0  ;;  %v250_v60 = vmax.f32 %v186_v52, 0.0 }
  0x35   :  { %v266_v62 = vmax.f32 %v202_v54, 0.0 }
  0x36   :  { %v299_v2 = vpack.c.bf16 %v250_v60, %v249_v59 }
  0x3c   :  { %799 = vmatmul.msk.bf16.gmra.mxu0 %vm329_vm0, %v288_v19  ;;  %v215_v19 = vadd.f32 %v882_v4, %v147_v11  ;;  %v67_v11 = vld [vmem:[%s1556_s0 + $0x170] sm:$0xff] }
  0x3e   :  { %807 = vmatmul.msk.bf16.gmra.mxu1 %vm329_vm0, %v296_v20  ;;  %v216_v20 = vadd.f32 %v882_v4, %v148_v12  ;;  %v279_v27 = vmax.f32 %v215_v19, 0.0  ;;  %v68_v12 = vld [vmem:[%s1556_s0 + $0x178] sm:$0xff]  ;;  %v135_v19 = vmul.f32 %v877_v3, %v67_v11 }
  0x3f   :  { %815 = vmatmul.msk.bf16.gmra.mxu2 %vm329_vm0, %v304_v21  ;;  %v231_v21 = vmax.f32 %v167_v13, 0.0  ;;  %v83_v13 = vld [vmem:[%s1556_s0 + $0x1f0] sm:$0xff] }
  0x40   :  { %823 = vmatmul.msk.bf16.gmra.mxu3 %vm329_vm0, %v312_v25  ;;  %v263_v25 = vmax.f32 %v199_v17, 0.0  ;;  %v280_v28 = vmax.f32 %v216_v20, 0.0  ;;  %v119_v17 = vmul.f32 %v877_v3, %v51_v8  ;;  %v136_v20 = vmul.f32 %v877_v3, %v68_v12 }
  0x41   :  { %v290_v29 = vpack.c.bf16 %v232_v22, %v231_v21  ;;  %v151_v21 = vmul.f32 %v877_v3, %v83_v13  ;;  %v152_v22 = vmul.f32 %v877_v3, %v84_v14 }
  0x42   :  { %v306_v31 = vpack.c.bf16 %v264_v26, %v263_v25  ;;  %v314_v35 = vpack.c.bf16 %v280_v28, %v279_v27  ;;  %v187_v25 = vadd.f32 %v882_v4, %v119_v17  ;;  %v188_v26 = vadd.f32 %v882_v4, %v120_v18 }
  0x43   :  { %v203_v27 = vadd.f32 %v882_v4, %v135_v19  ;;  %v204_v28 = vadd.f32 %v882_v4, %v136_v20 }
  0x44   :  { %v251_v33 = vmax.f32 %v187_v25, 0.0  ;;  %v252_v3 = vmax.f32 %v188_v26, 0.0 }
  0x45   :  { %v267_v34 = vmax.f32 %v203_v27, 0.0 }
  0x46   :  { %v300_v39 = vpack.c.bf16 %v252_v3, %v251_v33 }
  0x4c   :  { %800 = vmatmul.msk.bf16.gmra.mxu0 %vm329_vm0, %v289_v55  ;;  %v217_v55 = vadd.f32 %v882_v4, %v149_v47 }
  0x4e   :  { %808 = vmatmul.msk.bf16.gmra.mxu1 %vm329_vm0, %v297_v56  ;;  %v218_v56 = vadd.f32 %v882_v4, %v150_v48  ;;  %v281_v63 = vmax.f32 %v217_v55, 0.0 }
  0x4f   :  { %816 = vmatmul.msk.bf16.gmra.mxu2 %vm329_vm0, %v305_v57  ;;  %v233_v57 = vmax.f32 %v169_v49, 0.0 }
  0x50   :  { %824 = vmatmul.msk.bf16.gmra.mxu3 %vm329_vm0, %v313_v61  ;;  %v265_v61 = vmax.f32 %v201_v53, 0.0  ;;  %v282_v0 = vmax.f32 %v218_v56, 0.0 }
  0x51   :  { %v291_v1 = vpack.c.bf16 %v234_v58, %v233_v57 }
  0x52   :  { %v307_v5 = vpack.c.bf16 %v266_v62, %v265_v61  ;;  %v315_v9 = vpack.c.bf16 %v282_v0, %v281_v63 }
  0x5c   :  { %801 = vmatmul.msk.bf16.gmra.mxu0 %vm329_vm0, %v290_v29  ;;  %v219_v29 = vadd.f32 %v882_v4, %v151_v21 }
  0x5e   :  { %809 = vmatmul.msk.bf16.gmra.mxu1 %vm329_vm0, %v298_v30  ;;  %v220_v30 = vadd.f32 %v882_v4, %v152_v22  ;;  %v283_v36 = vmax.f32 %v219_v29, 0.0  ;;  %v1233_v4 = vld [vmem:[%s1559_s4] ss:$0 sm:$0xff] }
  0x5f   :  { %817 = vmatmul.msk.bf16.gmra.mxu2 %vm329_vm0, %v306_v31  ;;  %v235_v31 = vmax.f32 %v171_v23, 0.0 }
  0x60   :  { %825 = vmatmul.msk.bf16.gmra.mxu3 %vm329_vm0, %v314_v35  ;;  %v268_v35 = vmax.f32 %v204_v28, 0.0  ;;  %v284_v37 = vmax.f32 %v220_v30, 0.0 }
  0x61   :  { %v292_v38 = vpack.c.bf16 %v236_v32, %v235_v31 }
  0x62   :  { %v308_v40 = vpack.c.bf16 %v268_v35, %v267_v34  ;;  %v316_v41 = vpack.c.bf16 %v284_v37, %v283_v36 }
  0x6c   :  { %802 = vmatmul.msk.bf16.gmra.mxu0 %vm329_vm0, %v291_v1 }
  0x6e   :  { %810 = vmatmul.msk.bf16.gmra.mxu1 %vm329_vm0, %v299_v2 }
  0x6f   :  { %818 = vmatmul.msk.bf16.gmra.mxu2 %vm329_vm0, %v307_v5 }
  0x70   :  { %826 = vmatmul.msk.bf16.gmra.mxu3 %vm329_vm0, %v315_v9 }
  0x7c   :  { %803 = vmatmul.msk.bf16.gmra.mxu0 %vm329_vm0, %v292_v38 }
  0x7e   :  { %811 = vmatmul.msk.bf16.gmra.mxu1 %vm329_vm0, %v300_v39 }
  0x7f   :  { %819 = vmatmul.msk.bf16.gmra.mxu2 %vm329_vm0, %v308_v40 }
  0x80   :  { %827 = vmatmul.msk.bf16.gmra.mxu3 %vm329_vm0, %v316_v41 }
  0x89   :  { %v435_v42 = vpop.f32.mrf.mxu0 }
  0x8a   :  { %v436_v43 = vadd.f32 %v1233_v4, %v435_v42 }
  0x8b   :  { %v475_v44 = vpop.f32.mrf.mxu1 }
  0x8c   :  { %v476_v45 = vadd.f32 %v1233_v4, %v475_v44  ;;  %v595_v46 = vmax.f32 %v436_v43, 0.0 }
  0x8e   :  { %v611_v47 = vmax.f32 %v476_v45, 0.0  ;;  %v659_v48 = vpack.c.bf16 %v595_v46, %v595_v46 }
  0x90   :  { %v675_v49 = vpack.c.bf16 %v611_v47, %v611_v47  ;;  %724 = vst.msk [vmem:[%s1560_s5] sm:$0xf] %vm723_vm1, %v659_v48 }
  0x91   :  { %v437_v53 = vpop.f32.mrf.mxu0 }
  0x92   :  { %v515_v50 = vpop.f32.mrf.mxu2  ;;  %740 = vst.msk [vmem:[%s1560_s5 + $0x40] sm:$0xf] %vm723_vm1, %v675_v49  ;;  %v438_v55 = vadd.f32 %v1233_v4, %v437_v53 }
  0x93   :  { %v516_v51 = vadd.f32 %v1233_v4, %v515_v50  ;;  %v555_v52 = vpop.f32.mrf.mxu3  ;;  %v477_v56 = vpop.f32.mrf.mxu1 }
  0x94   :  { %v556_v54 = vadd.f32 %v1233_v4, %v555_v52  ;;  %v478_v58 = vadd.f32 %v1233_v4, %v477_v56  ;;  %v596_v60 = vmax.f32 %v438_v55, 0.0 }
  0x95   :  { %v627_v57 = vmax.f32 %v516_v51, 0.0 }
  0x96   :  { %v643_v59 = vmax.f32 %v556_v54, 0.0  ;;  %v612_v62 = vmax.f32 %v478_v58, 0.0  ;;  %v660_v0 = vpack.c.bf16 %v596_v60, %v596_v60 }
  0x97   :  { %v691_v61 = vpack.c.bf16 %v627_v57, %v627_v57 }
  0x98   :  { %v707_v63 = vpack.c.bf16 %v643_v59, %v643_v59  ;;  %v676_v1 = vpack.c.bf16 %v612_v62, %v612_v62  ;;  %725 = vst.msk [vmem:[%s1560_s5 + $0x4] sm:$0xf] %vm723_vm1, %v660_v0 }
  0x99   :  { %756 = vst.msk [vmem:[%s1560_s5 + $0x80] sm:$0xf] %vm723_vm1, %v691_v61  ;;  %v440_v7 = vpop.f32.mrf.mxu0 }
  0x9a   :  { %772 = vst.msk [vmem:[%s1560_s5 + $0xc0] sm:$0xf] %vm723_vm1, %v707_v63  ;;  %v517_v2 = vpop.f32.mrf.mxu2  ;;  %v441_v9 = vadd.f32 %v1233_v4, %v440_v7 }
  0x9b   :  { %v518_v5 = vadd.f32 %v1233_v4, %v517_v2  ;;  %v557_v6 = vpop.f32.mrf.mxu3  ;;  %741 = vst.msk [vmem:[%s1560_s5 + $0x44] sm:$0xf] %vm723_vm1, %v676_v1  ;;  %v480_v10 = vpop.f32.mrf.mxu1 }
  0x9c   :  { %v558_v8 = vadd.f32 %v1233_v4, %v557_v6  ;;  %v481_v12 = vadd.f32 %v1233_v4, %v480_v10  ;;  %v597_v14 = vmax.f32 %v441_v9, 0.0 }
  0x9d   :  { %v628_v11 = vmax.f32 %v518_v5, 0.0 }
  0x9e   :  { %v644_v13 = vmax.f32 %v558_v8, 0.0  ;;  %v613_v16 = vmax.f32 %v481_v12, 0.0  ;;  %v661_v18 = vpack.c.bf16 %v597_v14, %v597_v14 }
  0x9f   :  { %v692_v15 = vpack.c.bf16 %v628_v11, %v628_v11 }
  0xa0   :  { %v708_v17 = vpack.c.bf16 %v644_v13, %v644_v13  ;;  %v677_v19 = vpack.c.bf16 %v613_v16, %v613_v16  ;;  %726 = vst.msk [vmem:[%s1560_s5 + $0x8] sm:$0xf] %vm723_vm1, %v661_v18 }
  0xa1   :  { %757 = vst.msk [vmem:[%s1560_s5 + $0x84] sm:$0xf] %vm723_vm1, %v692_v15  ;;  %v442_v23 = vpop.f32.mrf.mxu0 }
  0xa2   :  { %773 = vst.msk [vmem:[%s1560_s5 + $0xc4] sm:$0xf] %vm723_vm1, %v708_v17  ;;  %v520_v20 = vpop.f32.mrf.mxu2  ;;  %v443_v25 = vadd.f32 %v1233_v4, %v442_v23 }
  0xa3   :  { %v521_v21 = vadd.f32 %v1233_v4, %v520_v20  ;;  %v560_v22 = vpop.f32.mrf.mxu3  ;;  %742 = vst.msk [vmem:[%s1560_s5 + $0x48] sm:$0xf] %vm723_vm1, %v677_v19  ;;  %v482_v26 = vpop.f32.mrf.mxu1 }
  0xa4   :  { %v561_v24 = vadd.f32 %v1233_v4, %v560_v22  ;;  %v483_v28 = vadd.f32 %v1233_v4, %v482_v26  ;;  %v598_v30 = vmax.f32 %v443_v25, 0.0 }
  0xa5   :  { %v629_v27 = vmax.f32 %v521_v21, 0.0 }
  0xa6   :  { %v645_v29 = vmax.f32 %v561_v24, 0.0  ;;  %v614_v32 = vmax.f32 %v483_v28, 0.0  ;;  %v662_v3 = vpack.c.bf16 %v598_v30, %v598_v30 }
  0xa7   :  { %v693_v31 = vpack.c.bf16 %v629_v27, %v629_v27 }
  0xa8   :  { %v709_v33 = vpack.c.bf16 %v645_v29, %v645_v29  ;;  %v678_v34 = vpack.c.bf16 %v614_v32, %v614_v32  ;;  %727 = vst.msk [vmem:[%s1560_s5 + $0xc] sm:$0xf] %vm723_vm1, %v662_v3 }
  0xa9   :  { %758 = vst.msk [vmem:[%s1560_s5 + $0x88] sm:$0xf] %vm723_vm1, %v693_v31  ;;  %v445_v38 = vpop.f32.mrf.mxu0 }
  0xaa   :  { %774 = vst.msk [vmem:[%s1560_s5 + $0xc8] sm:$0xf] %vm723_vm1, %v709_v33  ;;  %v522_v35 = vpop.f32.mrf.mxu2  ;;  %v446_v40 = vadd.f32 %v1233_v4, %v445_v38 }
  0xab   :  { %v523_v36 = vadd.f32 %v1233_v4, %v522_v35  ;;  %v562_v37 = vpop.f32.mrf.mxu3  ;;  %743 = vst.msk [vmem:[%s1560_s5 + $0x4c] sm:$0xf] %vm723_vm1, %v678_v34  ;;  %v485_v41 = vpop.f32.mrf.mxu1 }
  0xac   :  { %v563_v39 = vadd.f32 %v1233_v4, %v562_v37  ;;  %v486_v43 = vadd.f32 %v1233_v4, %v485_v41  ;;  %v599_v45 = vmax.f32 %v446_v40, 0.0 }
  0xad   :  { %v630_v42 = vmax.f32 %v523_v36, 0.0 }
  0xae   :  { %v646_v44 = vmax.f32 %v563_v39, 0.0  ;;  %v615_v47 = vmax.f32 %v486_v43, 0.0  ;;  %v663_v49 = vpack.c.bf16 %v599_v45, %v599_v45 }
  0xaf   :  { %v694_v46 = vpack.c.bf16 %v630_v42, %v630_v42 }
  0xb0   :  { %v710_v48 = vpack.c.bf16 %v646_v44, %v646_v44  ;;  %v679_v50 = vpack.c.bf16 %v615_v47, %v615_v47  ;;  %728 = vst.msk [vmem:[%s1560_s5 + $0x10] sm:$0xf] %vm723_vm1, %v663_v49 }
  0xb1   :  { %759 = vst.msk [vmem:[%s1560_s5 + $0x8c] sm:$0xf] %vm723_vm1, %v694_v46  ;;  %v447_v54 = vpop.f32.mrf.mxu0 }
  0xb2   :  { %775 = vst.msk [vmem:[%s1560_s5 + $0xcc] sm:$0xf] %vm723_vm1, %v710_v48  ;;  %v525_v51 = vpop.f32.mrf.mxu2  ;;  %v448_v56 = vadd.f32 %v1233_v4, %v447_v54 }
  0xb3   :  { %v526_v52 = vadd.f32 %v1233_v4, %v525_v51  ;;  %v565_v53 = vpop.f32.mrf.mxu3  ;;  %744 = vst.msk [vmem:[%s1560_s5 + $0x50] sm:$0xf] %vm723_vm1, %v679_v50  ;;  %v487_v57 = vpop.f32.mrf.mxu1 }
  0xb4   :  { %v566_v55 = vadd.f32 %v1233_v4, %v565_v53  ;;  %v488_v59 = vadd.f32 %v1233_v4, %v487_v57  ;;  %v600_v61 = vmax.f32 %v448_v56, 0.0 }
  0xb5   :  { %v631_v58 = vmax.f32 %v526_v52, 0.0 }
  0xb6   :  { %v647_v60 = vmax.f32 %v566_v55, 0.0  ;;  %v616_v63 = vmax.f32 %v488_v59, 0.0  ;;  %v664_v1 = vpack.c.bf16 %v600_v61, %v600_v61 }
  0xb7   :  { %v695_v62 = vpack.c.bf16 %v631_v58, %v631_v58 }
  0xb8   :  { %v711_v0 = vpack.c.bf16 %v647_v60, %v647_v60  ;;  %v680_v2 = vpack.c.bf16 %v616_v63, %v616_v63  ;;  %729 = vst.msk [vmem:[%s1560_s5 + $0x14] sm:$0xf] %vm723_vm1, %v664_v1 }
  0xb9   :  { %760 = vst.msk [vmem:[%s1560_s5 + $0x90] sm:$0xf] %vm723_vm1, %v695_v62  ;;  %v450_v8 = vpop.f32.mrf.mxu0 }
  0xba   :  { %776 = vst.msk [vmem:[%s1560_s5 + $0xd0] sm:$0xf] %vm723_vm1, %v711_v0  ;;  %v527_v5 = vpop.f32.mrf.mxu2  ;;  %v451_v10 = vadd.f32 %v1233_v4, %v450_v8 }
  0xbb   :  { %v528_v6 = vadd.f32 %v1233_v4, %v527_v5  ;;  %v567_v7 = vpop.f32.mrf.mxu3  ;;  %745 = vst.msk [vmem:[%s1560_s5 + $0x54] sm:$0xf] %vm723_vm1, %v680_v2  ;;  %v490_v11 = vpop.f32.mrf.mxu1 }
  0xbc   :  { %v568_v9 = vadd.f32 %v1233_v4, %v567_v7  ;;  %v491_v13 = vadd.f32 %v1233_v4, %v490_v11  ;;  %v601_v15 = vmax.f32 %v451_v10, 0.0 }
  0xbd   :  { %v632_v12 = vmax.f32 %v528_v6, 0.0 }
  0xbe   :  { %v648_v14 = vmax.f32 %v568_v9, 0.0  ;;  %v617_v17 = vmax.f32 %v491_v13, 0.0  ;;  %v665_v19 = vpack.c.bf16 %v601_v15, %v601_v15 }
  0xbf   :  { %v696_v16 = vpack.c.bf16 %v632_v12, %v632_v12 }
  0xc0   :  { %v712_v18 = vpack.c.bf16 %v648_v14, %v648_v14  ;;  %v681_v20 = vpack.c.bf16 %v617_v17, %v617_v17  ;;  %730 = vst.msk [vmem:[%s1560_s5 + $0x18] sm:$0xf] %vm723_vm1, %v665_v19 }
  0xc1   :  { %761 = vst.msk [vmem:[%s1560_s5 + $0x94] sm:$0xf] %vm723_vm1, %v696_v16  ;;  %v452_v24 = vpop.f32.mrf.mxu0 }
  0xc2   :  { %777 = vst.msk [vmem:[%s1560_s5 + $0xd4] sm:$0xf] %vm723_vm1, %v712_v18  ;;  %v530_v21 = vpop.f32.mrf.mxu2  ;;  %v453_v26 = vadd.f32 %v1233_v4, %v452_v24 }
  0xc3   :  { %v531_v22 = vadd.f32 %v1233_v4, %v530_v21  ;;  %v570_v23 = vpop.f32.mrf.mxu3  ;;  %746 = vst.msk [vmem:[%s1560_s5 + $0x58] sm:$0xf] %vm723_vm1, %v681_v20  ;;  %v492_v27 = vpop.f32.mrf.mxu1 }
  0xc4   :  { %v571_v25 = vadd.f32 %v1233_v4, %v570_v23  ;;  %v493_v29 = vadd.f32 %v1233_v4, %v492_v27  ;;  %v602_v31 = vmax.f32 %v453_v26, 0.0 }
  0xc5   :  { %v633_v28 = vmax.f32 %v531_v22, 0.0 }
  0xc6   :  { %v649_v30 = vmax.f32 %v571_v25, 0.0  ;;  %v618_v33 = vmax.f32 %v493_v29, 0.0  ;;  %v666_v34 = vpack.c.bf16 %v602_v31, %v602_v31 }
  0xc7   :  { %v697_v32 = vpack.c.bf16 %v633_v28, %v633_v28 }
  0xc8   :  { %v713_v3 = vpack.c.bf16 %v649_v30, %v649_v30  ;;  %v682_v35 = vpack.c.bf16 %v618_v33, %v618_v33  ;;  %731 = vst.msk [vmem:[%s1560_s5 + $0x1c] sm:$0xf] %vm723_vm1, %v666_v34 }
  0xc9   :  { %762 = vst.msk [vmem:[%s1560_s5 + $0x98] sm:$0xf] %vm723_vm1, %v697_v32  ;;  %v455_v39 = vpop.f32.mrf.mxu0 }
  0xca   :  { %778 = vst.msk [vmem:[%s1560_s5 + $0xd8] sm:$0xf] %vm723_vm1, %v713_v3  ;;  %v532_v36 = vpop.f32.mrf.mxu2  ;;  %v456_v41 = vadd.f32 %v1233_v4, %v455_v39 }
  0xcb   :  { %v533_v37 = vadd.f32 %v1233_v4, %v532_v36  ;;  %v572_v38 = vpop.f32.mrf.mxu3  ;;  %747 = vst.msk [vmem:[%s1560_s5 + $0x5c] sm:$0xf] %vm723_vm1, %v682_v35  ;;  %v495_v42 = vpop.f32.mrf.mxu1 }
  0xcc   :  { %v573_v40 = vadd.f32 %v1233_v4, %v572_v38  ;;  %v496_v44 = vadd.f32 %v1233_v4, %v495_v42  ;;  %v603_v46 = vmax.f32 %v456_v41, 0.0 }
  0xcd   :  { %v634_v43 = vmax.f32 %v533_v37, 0.0 }
  0xce   :  { %v650_v45 = vmax.f32 %v573_v40, 0.0  ;;  %v619_v48 = vmax.f32 %v496_v44, 0.0  ;;  %v667_v50 = vpack.c.bf16 %v603_v46, %v603_v46 }
  0xcf   :  { %v698_v47 = vpack.c.bf16 %v634_v43, %v634_v43 }
  0xd0   :  { %v714_v49 = vpack.c.bf16 %v650_v45, %v650_v45  ;;  %v683_v51 = vpack.c.bf16 %v619_v48, %v619_v48  ;;  %732 = vst.msk [vmem:[%s1560_s5 + $0x20] sm:$0xf] %vm723_vm1, %v667_v50 }
  0xd1   :  { %763 = vst.msk [vmem:[%s1560_s5 + $0x9c] sm:$0xf] %vm723_vm1, %v698_v47  ;;  %v457_v55 = vpop.f32.mrf.mxu0 }
  0xd2   :  { %779 = vst.msk [vmem:[%s1560_s5 + $0xdc] sm:$0xf] %vm723_vm1, %v714_v49  ;;  %v535_v52 = vpop.f32.mrf.mxu2  ;;  %v458_v57 = vadd.f32 %v1233_v4, %v457_v55 }
  0xd3   :  { %v536_v53 = vadd.f32 %v1233_v4, %v535_v52  ;;  %v575_v54 = vpop.f32.mrf.mxu3  ;;  %748 = vst.msk [vmem:[%s1560_s5 + $0x60] sm:$0xf] %vm723_vm1, %v683_v51  ;;  %v497_v58 = vpop.f32.mrf.mxu1 }
  0xd4   :  { %v576_v56 = vadd.f32 %v1233_v4, %v575_v54  ;;  %v498_v60 = vadd.f32 %v1233_v4, %v497_v58  ;;  %v604_v62 = vmax.f32 %v458_v57, 0.0 }
  0xd5   :  { %v635_v59 = vmax.f32 %v536_v53, 0.0 }
  0xd6   :  { %v651_v61 = vmax.f32 %v576_v56, 0.0  ;;  %v620_v0 = vmax.f32 %v498_v60, 0.0  ;;  %v668_v2 = vpack.c.bf16 %v604_v62, %v604_v62 }
  0xd7   :  { %v699_v63 = vpack.c.bf16 %v635_v59, %v635_v59 }
  0xd8   :  { %v715_v1 = vpack.c.bf16 %v651_v61, %v651_v61  ;;  %v684_v5 = vpack.c.bf16 %v620_v0, %v620_v0  ;;  %733 = vst.msk [vmem:[%s1560_s5 + $0x24] sm:$0xf] %vm723_vm1, %v668_v2 }
  0xd9   :  { %764 = vst.msk [vmem:[%s1560_s5 + $0xa0] sm:$0xf] %vm723_vm1, %v699_v63  ;;  %v460_v9 = vpop.f32.mrf.mxu0 }
  0xda   :  { %780 = vst.msk [vmem:[%s1560_s5 + $0xe0] sm:$0xf] %vm723_vm1, %v715_v1  ;;  %v537_v6 = vpop.f32.mrf.mxu2  ;;  %v461_v11 = vadd.f32 %v1233_v4, %v460_v9 }
  0xdb   :  { %v538_v7 = vadd.f32 %v1233_v4, %v537_v6  ;;  %v577_v8 = vpop.f32.mrf.mxu3  ;;  %749 = vst.msk [vmem:[%s1560_s5 + $0x64] sm:$0xf] %vm723_vm1, %v684_v5  ;;  %v500_v12 = vpop.f32.mrf.mxu1 }
  0xdc   :  { %v578_v10 = vadd.f32 %v1233_v4, %v577_v8  ;;  %v501_v14 = vadd.f32 %v1233_v4, %v500_v12  ;;  %v605_v16 = vmax.f32 %v461_v11, 0.0 }
  0xdd   :  { %v636_v13 = vmax.f32 %v538_v7, 0.0 }
  0xde   :  { %v652_v15 = vmax.f32 %v578_v10, 0.0  ;;  %v621_v18 = vmax.f32 %v501_v14, 0.0  ;;  %v669_v20 = vpack.c.bf16 %v605_v16, %v605_v16 }
  0xdf   :  { %v700_v17 = vpack.c.bf16 %v636_v13, %v636_v13 }
  0xe0   :  { %v716_v19 = vpack.c.bf16 %v652_v15, %v652_v15  ;;  %v685_v21 = vpack.c.bf16 %v621_v18, %v621_v18  ;;  %734 = vst.msk [vmem:[%s1560_s5 + $0x28] sm:$0xf] %vm723_vm1, %v669_v20 }
  0xe1   :  { %765 = vst.msk [vmem:[%s1560_s5 + $0xa4] sm:$0xf] %vm723_vm1, %v700_v17  ;;  %v462_v25 = vpop.f32.mrf.mxu0 }
  0xe2   :  { %781 = vst.msk [vmem:[%s1560_s5 + $0xe4] sm:$0xf] %vm723_vm1, %v716_v19  ;;  %v540_v22 = vpop.f32.mrf.mxu2  ;;  %v463_v27 = vadd.f32 %v1233_v4, %v462_v25 }
  0xe3   :  { %v541_v23 = vadd.f32 %v1233_v4, %v540_v22  ;;  %v580_v24 = vpop.f32.mrf.mxu3  ;;  %750 = vst.msk [vmem:[%s1560_s5 + $0x68] sm:$0xf] %vm723_vm1, %v685_v21  ;;  %v502_v28 = vpop.f32.mrf.mxu1 }
  0xe4   :  { %v581_v26 = vadd.f32 %v1233_v4, %v580_v24  ;;  %v503_v30 = vadd.f32 %v1233_v4, %v502_v28  ;;  %v606_v32 = vmax.f32 %v463_v27, 0.0 }
  0xe5   :  { %v637_v29 = vmax.f32 %v541_v23, 0.0 }
  0xe6   :  { %v653_v31 = vmax.f32 %v581_v26, 0.0  ;;  %v622_v3 = vmax.f32 %v503_v30, 0.0  ;;  %v670_v35 = vpack.c.bf16 %v606_v32, %v606_v32 }
  0xe7   :  { %v701_v33 = vpack.c.bf16 %v637_v29, %v637_v29 }
  0xe8   :  { %v717_v34 = vpack.c.bf16 %v653_v31, %v653_v31  ;;  %v686_v36 = vpack.c.bf16 %v622_v3, %v622_v3  ;;  %735 = vst.msk [vmem:[%s1560_s5 + $0x2c] sm:$0xf] %vm723_vm1, %v670_v35 }
  0xe9   :  { %766 = vst.msk [vmem:[%s1560_s5 + $0xa8] sm:$0xf] %vm723_vm1, %v701_v33  ;;  %v465_v40 = vpop.f32.mrf.mxu0 }
  0xea   :  { %782 = vst.msk [vmem:[%s1560_s5 + $0xe8] sm:$0xf] %vm723_vm1, %v717_v34  ;;  %v542_v37 = vpop.f32.mrf.mxu2  ;;  %v466_v42 = vadd.f32 %v1233_v4, %v465_v40 }
  0xeb   :  { %v543_v38 = vadd.f32 %v1233_v4, %v542_v37  ;;  %v582_v39 = vpop.f32.mrf.mxu3  ;;  %751 = vst.msk [vmem:[%s1560_s5 + $0x6c] sm:$0xf] %vm723_vm1, %v686_v36  ;;  %v505_v43 = vpop.f32.mrf.mxu1 }
  0xec   :  { %v583_v41 = vadd.f32 %v1233_v4, %v582_v39  ;;  %v506_v45 = vadd.f32 %v1233_v4, %v505_v43  ;;  %v607_v47 = vmax.f32 %v466_v42, 0.0 }
  0xed   :  { %v638_v44 = vmax.f32 %v543_v38, 0.0 }
  0xee   :  { %v654_v46 = vmax.f32 %v583_v41, 0.0  ;;  %v623_v49 = vmax.f32 %v506_v45, 0.0  ;;  %v671_v51 = vpack.c.bf16 %v607_v47, %v607_v47 }
  0xef   :  { %v702_v48 = vpack.c.bf16 %v638_v44, %v638_v44 }
  0xf0   :  { %v718_v50 = vpack.c.bf16 %v654_v46, %v654_v46  ;;  %v687_v52 = vpack.c.bf16 %v623_v49, %v623_v49  ;;  %736 = vst.msk [vmem:[%s1560_s5 + $0x30] sm:$0xf] %vm723_vm1, %v671_v51 }
  0xf1   :  { %767 = vst.msk [vmem:[%s1560_s5 + $0xac] sm:$0xf] %vm723_vm1, %v702_v48  ;;  %v467_v56 = vpop.f32.mrf.mxu0 }
  0xf2   :  { %783 = vst.msk [vmem:[%s1560_s5 + $0xec] sm:$0xf] %vm723_vm1, %v718_v50  ;;  %v545_v53 = vpop.f32.mrf.mxu2  ;;  %v468_v58 = vadd.f32 %v1233_v4, %v467_v56 }
  0xf3   :  { %v546_v54 = vadd.f32 %v1233_v4, %v545_v53  ;;  %v585_v55 = vpop.f32.mrf.mxu3  ;;  %752 = vst.msk [vmem:[%s1560_s5 + $0x70] sm:$0xf] %vm723_vm1, %v687_v52  ;;  %v507_v59 = vpop.f32.mrf.mxu1 }
  0xf4   :  { %v586_v57 = vadd.f32 %v1233_v4, %v585_v55  ;;  %v508_v61 = vadd.f32 %v1233_v4, %v507_v59  ;;  %v608_v63 = vmax.f32 %v468_v58, 0.0 }
  0xf5   :  { %v639_v60 = vmax.f32 %v546_v54, 0.0 }
  0xf6   :  { %v655_v62 = vmax.f32 %v586_v57, 0.0  ;;  %v624_v1 = vmax.f32 %v508_v61, 0.0  ;;  %v672_v5 = vpack.c.bf16 %v608_v63, %v608_v63 }
  0xf7   :  { %v703_v0 = vpack.c.bf16 %v639_v60, %v639_v60 }
  0xf8   :  { %v719_v2 = vpack.c.bf16 %v655_v62, %v655_v62  ;;  %v688_v6 = vpack.c.bf16 %v624_v1, %v624_v1  ;;  %737 = vst.msk [vmem:[%s1560_s5 + $0x34] sm:$0xf] %vm723_vm1, %v672_v5 }
  0xf9   :  { %768 = vst.msk [vmem:[%s1560_s5 + $0xb0] sm:$0xf] %vm723_vm1, %v703_v0  ;;  %v470_v10 = vpop.f32.mrf.mxu0 }
  0xfa   :  { %784 = vst.msk [vmem:[%s1560_s5 + $0xf0] sm:$0xf] %vm723_vm1, %v719_v2  ;;  %v547_v7 = vpop.f32.mrf.mxu2  ;;  %v471_v12 = vadd.f32 %v1233_v4, %v470_v10 }
  0xfb   :  { %v548_v8 = vadd.f32 %v1233_v4, %v547_v7  ;;  %v587_v9 = vpop.f32.mrf.mxu3  ;;  %753 = vst.msk [vmem:[%s1560_s5 + $0x74] sm:$0xf] %vm723_vm1, %v688_v6  ;;  %v510_v13 = vpop.f32.mrf.mxu1 }
  0xfc   :  { %v588_v11 = vadd.f32 %v1233_v4, %v587_v9  ;;  %v511_v15 = vadd.f32 %v1233_v4, %v510_v13  ;;  %v609_v17 = vmax.f32 %v471_v12, 0.0 }
  0xfd   :  { %v640_v14 = vmax.f32 %v548_v8, 0.0 }
  0xfe   :  { %v656_v16 = vmax.f32 %v588_v11, 0.0  ;;  %v625_v19 = vmax.f32 %v511_v15, 0.0  ;;  %v673_v21 = vpack.c.bf16 %v609_v17, %v609_v17 }
  0xff   :  { %v704_v18 = vpack.c.bf16 %v640_v14, %v640_v14 }
 0x100   :  { %v720_v20 = vpack.c.bf16 %v656_v16, %v656_v16  ;;  %v689_v22 = vpack.c.bf16 %v625_v19, %v625_v19  ;;  %738 = vst.msk [vmem:[%s1560_s5 + $0x38] sm:$0xf] %vm723_vm1, %v673_v21 }
 0x101   :  { %769 = vst.msk [vmem:[%s1560_s5 + $0xb4] sm:$0xf] %vm723_vm1, %v704_v18  ;;  %v472_v26 = vpop.f32.mrf.mxu0 }
 0x102   :  { %785 = vst.msk [vmem:[%s1560_s5 + $0xf4] sm:$0xf] %vm723_vm1, %v720_v20  ;;  %v550_v23 = vpop.f32.mrf.mxu2  ;;  %v473_v28 = vadd.f32 %v1233_v4, %v472_v26 }
 0x103   :  { %v551_v24 = vadd.f32 %v1233_v4, %v550_v23  ;;  %v590_v25 = vpop.f32.mrf.mxu3  ;;  %754 = vst.msk [vmem:[%s1560_s5 + $0x78] sm:$0xf] %vm723_vm1, %v689_v22  ;;  %v512_v29 = vpop.f32.mrf.mxu1 }
 0x104   :  { %v591_v27 = vadd.f32 %v1233_v4, %v590_v25  ;;  %v513_v31 = vadd.f32 %v1233_v4, %v512_v29  ;;  %v610_v33 = vmax.f32 %v473_v28, 0.0 }
 0x105   :  { %v641_v30 = vmax.f32 %v551_v24, 0.0 }
 0x106   :  { %v657_v32 = vmax.f32 %v591_v27, 0.0  ;;  %v626_v34 = vmax.f32 %v513_v31, 0.0  ;;  %v674_v36 = vpack.c.bf16 %v610_v33, %v610_v33 }
 0x107   :  { %v705_v3 = vpack.c.bf16 %v641_v30, %v641_v30 }
 0x108   :  { %v721_v35 = vpack.c.bf16 %v657_v32, %v657_v32  ;;  %v690_v37 = vpack.c.bf16 %v626_v34, %v626_v34  ;;  %739 = vst.msk [vmem:[%s1560_s5 + $0x3c] sm:$0xf] %vm723_vm1, %v674_v36 }
 0x109   :  { %770 = vst.msk [vmem:[%s1560_s5 + $0xb8] sm:$0xf] %vm723_vm1, %v705_v3 }
 0x10a   :  { %786 = vst.msk [vmem:[%s1560_s5 + $0xf8] sm:$0xf] %vm723_vm1, %v721_v35  ;;  %v552_v38 = vpop.f32.mrf.mxu2 }
 0x10b   :  { %v553_v39 = vadd.f32 %v1233_v4, %v552_v38  ;;  %v592_v40 = vpop.f32.mrf.mxu3  ;;  %755 = vst.msk [vmem:[%s1560_s5 + $0x7c] sm:$0xf] %vm723_vm1, %v690_v37 }
 0x10c   :  { %v593_v41 = vadd.f32 %v1233_v4, %v592_v40 }
 0x10d   :  { %v642_v42 = vmax.f32 %v553_v39, 0.0 }
 0x10e   :  { %v658_v43 = vmax.f32 %v593_v41, 0.0 }
 0x10f   :  { %v706_v44 = vpack.c.bf16 %v642_v42, %v642_v42 }
 0x110   :  { %v722_v45 = vpack.c.bf16 %v658_v43, %v658_v43 }
 0x111   :  { %771 = vst.msk [vmem:[%s1560_s5 + $0xbc] sm:$0xf] %vm723_vm1, %v706_v44 }
 0x112   :  { %787 = vst.msk [vmem:[%s1560_s5 + $0xfc] sm:$0xf] %vm723_vm1, %v722_v45 }

// kernel: bottleneck_block_forward.4
= control target key start
LH: loop header
LB: loop body
LE: loop exit
PB: predicated region body
PF: predicated region fallthrough
CT: control target
= control target key end

     0   :  { %s818_s18 = smov 0   ;;  %s820_s19 = smov 0   ;;  %s921_s0 = inlined_call_operand.vmem [shape: bf16[2,18,9,16], index: 0, kind: input, shape index: {}, may-alias: {0,1,2}]   ;;  %s922_s1 = inlined_call_operand.vmem [shape: bf16[2,18,9,16], index: 1, kind: input, shape index: {}, may-alias: {0,1,2}]   ;;  %s923_s2 = inlined_call_operand.vmem [shape: bf16[2,18,9,16], index: 2, kind: input, shape index: {}, may-alias: {0,1,2}]   ;;  %s924_s3 = inlined_call_operand.vmem [shape: bf16[96,8], index: 3, kind: input, shape index: {}]   ;;  %s925_s4 = inlined_call_operand.vmem [shape: f32[1,8], index: 4, kind: input, shape index: {}]   ;;  %s926_s5 = inlined_call_operand.vmem [shape: bf16[2,8,8,8], index: 5, kind: output, shape index: {}]  }
   0x1   :  { %s822_s20 = smov 0   ;;  %s824_s21 = smov 0  }
   0x2   :  { %s826_s22 = smov 0  }
   0x3 LB: > { %s24_s23 = sadd.s32 1, %s773_s20  ;;  %s27_s24 = sadd.s32 1, %s777_s21  ;;  %s781_s22 = sphi %s826_s22, %s15_s22   ;;  %s777_s21 = sphi %s824_s21, %s930_s21   ;;  %s773_s20 = sphi %s822_s20, %s929_s20   ;;  %s769_s19 = sphi %s820_s19, %s928_s19   ;;  %s765_s18 = sphi %s818_s18, %s927_s18  }
   0x4   : > { %p25_p0 = scmp.ge.s32.totalorder %s24_s23, 8  ;;  %p646_p1 = scmp.ge.s32.totalorder %s781_s22, 1 }
   0x5   : > { %p259_p2 = scmp.lt.s32.totalorder %s781_s22, 17 }
   0x6   : > { %s932_s23 = smov (%p25_p0, %s24_s23), 0  ;;  %s934_s24 = smov (!%p25_p0, %s27_s24), %s777_s21 }
   0x7   : > { %p260_p3 = pnand %p646_p1, %p259_p2  ;;  %p29_p4 = scmp.ge.s32.totalorder %s934_s24, 2 }
   0x8   : > { %s851_s25 = sshll.u32 (!%p260_p3), %s765_s18, 1  ;;  %p318_p5 = scmp.lt.s32.totalorder (!%p260_p3), %s769_s19, 1 }
   0x9   : > { %s936_s24 = smov (%p29_p4, %s934_s24), 0  ;;  %263 = sbr.rel (%p260_p3) target bundleno = 292 (0x124), region = 40 }
   0xa   : > { %p320_p6 = scmp.lt.s32.totalorder (!%p260_p3), %s851_s25, 17  ;;  %s329_s30 = sadd.s32 (!%p260_p3), 1, %s851_s25 }
   0xb   : > { %p332_p7 = scmp.lt.s32.totalorder (!%p260_p3), %s329_s30, 17  ;;  %s342_s14 = sadd.s32 (!%p260_p3), 2, %s851_s25 }
   0xc   : > { %p345_p8 = scmp.lt.s32.totalorder (!%p260_p3), %s342_s14, 17  ;;  %s785_s15 = smov (!%p260_p3), 32  }
   0xd   : > { %s787_s16 = smov (!%p260_p3), 64   ;;  %p356_p9 = scmp.lt.s32.totalorder (!%p260_p3), %s765_s18, 7 }
   0xe   : > { %s938_s19 = smov (!%p318_p5, %s769_s19), 1  ;;  %v695_v0 = vld [vmem:[%s924_s3 + $0x28] sm:$0xff]  ;;  %v694_v1 = vld [vmem:[%s924_s3 + $0x20] sm:$0xff]  ;;  %v693_v2 = vld [vmem:[%s924_s3 + $0x18] sm:$0xff]  ;;  %s940_s30 = smov (!%p332_p7, %s329_s30), 17  ;;  %vm417_vm0 = vcmask 130048  }
   0xf   : > { %s321_s28 = scalar_select %p320_p6, %s851_s25, 17  ;;  %490 = vmatpush.bf16.msra.mxu0 %v695_v0  ;;  %v692_v30 = vld [vmem:[%s924_s3 + $0x10] sm:$0xff]  ;;  %v691_v31 = vld [vmem:[%s924_s3 + $0x8] sm:$0xff]  ;;  %v690_v32 = vld [vmem:[%s924_s3] sm:$0xff]  ;;  %vm421_vm1 = vcmask 261120   ;;  %vm424_vm2 = vcmask 392192  }
  0x10   : > { %s861_s29 = smul.u32 36, %s938_s19  ;;  %s651_s17 = sshll.u32 %s940_s30, 1  ;;  %vm427_vm3 = vcmask 523264   ;;  %vm430_vm4 = vcmask 654336   ;;  %vm485_vm5 = vcmask 785408   ;;  %vm503_vm6 = vcmask 60416  }
  0x11   : > { %s648_s8 = sshll.u32 %s321_s28, 1  ;;  %s942_s14 = smov (!%p345_p8, %s342_s14), 17  ;;  %v742_v44 = vld [vmem:[%s925_s4] ss:$0 sm:$0xff] }
  0x12   : > { %s324_s9 = sadd.s32 %s861_s29, %s648_s8  ;;  %s336_s26 = sadd.s32 %s861_s29, %s651_s17 }
  0x13   : > { %s649_s10 = sshll.u32 %s324_s9, 2  ;;  %491 = vmatpush.bf16.msra.mxu0 %v694_v1  ;;  %s652_s27 = sshll.u32 %s336_s26, 2 }
  0x14   : > { %s871_s13 = scalar_lea.vmem %s921_s0, %s649_s10  ;;  %s338_s6 = scalar_lea.vmem %s922_s1, %s652_s27 }
  0x15   : > { %v660_v3 = vld [vmem:[%s871_s13] sm:$0xf]  ;;  %v689_v4 = vld [vmem:[%s871_s13] sm:$0x10]  ;;  %s654_s7 = sshll.u32 %s942_s14, 1  ;;  %s783_s30 = smov 16  }
  0x16   : > { %v661_v5 = vor.u32 %v689_v4, %v660_v3  ;;  %v365_v9 = vld [vmem:[%s338_s6] sm:$0xf]  ;;  %v366_v10 = vld [vmem:[%s338_s6 + $0x4] sm:$0x1]  ;;  %s349_s8 = sadd.s32 %s861_s29, %s654_s7  ;;  %s784_s14 = smov 48  }
  0x17   : > { %492 = vmatpush.bf16.msra.mxu0 %v693_v2  ;;  %v384_v12 = vunpack.c.l.b16 %v365_v9  ;;  %v389_v13 = vunpack.c.l.b16 %v366_v10  ;;  %s655_s9 = sshll.u32 %s349_s8, 2  ;;  %s786_s29 = smov 80   ;;  %v363_v34 = vld [vmem:[%s871_s13] sm:$0xf] }
  0x18   : > { %v375_v6 = vshrl.u32 %v661_v5, 16  ;;  %v377_v7 = vshll.u32 %v661_v5, 16  ;;  %s351_s12 = scalar_lea.vmem %s923_s2, %s655_s9  ;;  %s944_s18 = smov (!%p356_p9, %s765_s18), 7 }
  0x19   : > { %v390_v14 = vpack.c.b16 %v389_v13, %v384_v12  ;;  %v367_v17 = vld [vmem:[%s351_s12] sm:$0xf]  ;;  %v368_v18 = vld [vmem:[%s351_s12 + $0x4] sm:$0x1]  ;;  %v385_v20 = vpack.c.b16 %v384_v12, %v384_v12  ;;  %s656_s13 = sshll.u32 %s938_s19, 3 }
  0x1a   : > { %v379_v8 = vrot.slane %v377_v7, 1  ;;  %v401_v21 = vunpack.c.l.b16 %v367_v17  ;;  %v406_v22 = vunpack.c.l.b16 %v368_v18  ;;  %s359_s8 = sadd.s32 %s656_s13, %s944_s18 }
  0x1b   : > { %v392_v15 = vshrl.u32 %v390_v14, 16  ;;  %v394_v16 = vshll.u32 %v390_v14, 16  ;;  %493 = vmatpush.bf16.msra.mxu0 %v692_v30  ;;  %s657_s9 = sshll.u32 %s359_s8, 2 }
  0x1c   : > { %v380_v11 = vor.u32 %v379_v8, %v375_v6  ;;  %v407_v24 = vpack.c.b16 %v406_v22, %v401_v21  ;;  %v402_v28 = vpack.c.b16 %v401_v21, %v401_v21  ;;  %s361_s12 = scalar_lea.vmem %s926_s5, %s657_s9 }
  0x1d   : > { %v396_v19 = vrot.slane %v394_v16, 1 }
  0x1e   : > { %381 = vrot.lane.b32.xlu0 %v380_v11, %s783_s30  ;;  %v409_v25 = vshrl.u32 %v407_v24, 16  ;;  %v411_v26 = vshll.u32 %v407_v24, 16 }
  0x1f   : > { %v397_v23 = vor.u32 %v396_v19, %v392_v15  ;;  %494 = vmatpush.bf16.msra.mxu0 %v691_v31 }
  0x20   : > { %v413_v27 = vrot.slane %v411_v26, 1 }
  0x21   : > { %398 = vrot.lane.b32.xlu1 %v397_v23, %s784_s14 }
  0x22   : > { %v414_v29 = vor.u32 %v413_v27, %v409_v25 }
  0x23   : > { %495 = vmatpush.bf16.msra.mxu0 %v690_v32 }
  0x24   : > { %415 = vrot.lane.b32.xlu2 %v414_v29, %s786_s29 }
  0x26   : > { %386 = vrot.lane.b32.xlu0 %v385_v20, %s785_s15 }
  0x29   : > { %403 = vrot.lane.b32.xlu1 %v402_v28, %s787_s16 }
  0x7e   : > { %v416_v40 = vpop.permute.xlu2 %415 }
  0x90   : > { %v382_v33 = vpop.permute.xlu0 %381 }
  0x91   : > { %v420_v37 = vsel %vm417_vm0, %v363_v34, %v382_v33 }
  0x93   : > { %v399_v35 = vpop.permute.xlu1 %398 }
  0x98   : > { %v387_v36 = vpop.permute.xlu0 %386 }
  0x99   : > { %v423_v38 = vsel %vm421_vm1, %v420_v37, %v387_v36 }
  0x9a   : > { %v426_v39 = vsel %vm424_vm2, %v423_v38, %v399_v35 }
  0x9b   : > { %v404_v41 = vpop.permute.xlu1 %403 }
  0x9c   : > { %v429_v42 = vsel %vm427_vm3, %v426_v39, %v404_v41 }
  0x9d   : > { %v432_v43 = vsel %vm430_vm4, %v429_v42, %v416_v40 }
  0x9e   : > { %686 = vmatmul.msk.bf16.vlgmr.msra.gmra.mxu0 %vm485_vm5, %v432_v43 }
 0x11b   : > { %v497_v45 = vpop.f32.mrf.mxu0 }
 0x11c   : > { %v498_v46 = vadd.f32 %v742_v44, %v497_v45 }
 0x11e   : > { %v501_v47 = vmax.f32 %v498_v46, 0.0 }
 0x120   : > { %v502_v48 = vpack.c.bf16 %v501_v47, %v501_v47 }
 0x122   : > { %504 = vst.msk [vmem:[%s361_s12] sm:$0xf] %vm503_vm6, %v502_v48 }
 0x123   : > { %v499_v49 = vpop.f32.mrf.mxu0 }
 0x124 PF: > { %s15_s22 = sadd.s32 1, %s781_s22   ;;  %s927_s18 = smov %s773_s20 }
 0x125   : > { %p12_p10 = scmp.ge.s32.totalorder %s15_s22, 18   ;;  %s928_s19 = smov %s777_s21 }
 0x126   : > { %s929_s20 = smov %s932_s23  ;;  %s930_s21 = smov %s936_s24 }
 0x127   :  { %14 = sbr.rel (!%p12_p10) target bundleno = 3 (0x3), region = 76 }

// kernel: bottleneck_block_forward.5
= control target key start
LH: loop header
LB: loop body
LE: loop exit
PB: predicated region body
PF: predicated region fallthrough
CT: control target
= control target key end

     0   :  { %vm108_vm0 = vcmask 1043456   ;;  %vm83_vm1 = vcmask 64512   ;;  %vm193_vm2 = vcmask 130048   ;;  %s578_s0 = inlined_call_operand.vmem [shape: bf16[128,8], index: 0, kind: input, shape index: {}]   ;;  %s579_s1 = inlined_call_operand.vmem [shape: bf16[8,32], index: 1, kind: input, shape index: {}]   ;;  %s580_s2 = inlined_call_operand.vmem [shape: f32[1,32], index: 2, kind: input, shape index: {}]   ;;  %s581_s3 = inlined_call_operand.vmem [shape: f32[128,16], index: 3, kind: input, shape index: {}]   ;;  %s582_s4 = inlined_call_operand.vmem [shape: bf16[16,32], index: 4, kind: input, shape index: {}]   ;;  %s583_s5 = inlined_call_operand.hbm [shape: f32[128,32], index: 5, kind: output, shape index: {}]  }
   0x1   :  { %v38_v0 = vld [vmem:[%s579_s1] sm:$0xf]  ;;  %v162_v6 = vld [vmem:[%s581_s3 + $0x8] sm:$0xff] }
   0x2   :  { %v378_v1 = vld [vmem:[%s582_s4] sm:$0xff]  ;;  %v110_v3 = vsel %vm108_vm0, %v38_v0, 0  ;;  %v170_v9 = vld [vmem:[%s581_s3 + $0x48] sm:$0xff] }
   0x3   :  { %v370_v2 = vld [vmem:[%s578_s0] sm:$0xff]  ;;  %119 = vmatpush.bf16.msra.mxu0 %v110_v3  ;;  %379 = vmatpush.bf16.msra.mxu2 %v110_v3 }
   0x4   :  { %v374_v4 = vld [vmem:[%s578_s0 + $0x20] sm:$0xff]  ;;  %225 = vmatpush.bf16.msra.mxu1 %v378_v1  ;;  %380 = vmatpush.bf16.msra.mxu3 %v378_v1 }
   0x5   :  { %v161_v5 = vld [vmem:[%s581_s3] sm:$0xff] }
   0x6   :  { %v177_v7 = vpack.c.bf16 %v162_v6, %v161_v5  ;;  %v169_v8 = vld [vmem:[%s581_s3 + $0x40] sm:$0xff]  ;;  %350 = vmatmul.msk.bf16.vlgmr.msra.gmra.mxu0 %vm83_vm1, %v370_v2  ;;  %354 = vmatmul.msk.bf16.vlgmr.msra.gmra.mxu2 %vm83_vm1, %v374_v4 }
   0x7   :  { %v181_v10 = vpack.c.bf16 %v170_v9, %v169_v8 }
   0x8   :  { %362 = vmatmul.msk.bf16.vlgmr.msra.gmra.mxu1 %vm193_vm2, %v177_v7 }
   0x9   :  { %366 = vmatmul.msk.bf16.vlgmr.msra.gmra.mxu3 %vm193_vm2, %v181_v10 }
   0xa   :  { %10 = vsyncpa [#allocation3], 0  ;;  %v163_v11 = vld [vmem:[%s581_s3 + $0x10] sm:$0xff]  ;;  %v164_v12 = vld [vmem:[%s581_s3 + $0x18] sm:$0xff]  ;;  %vm283_vm3 = vcmask 261120   ;;  %s306_s19 = sshll.u32 %s583_s5, 4  ;;  %s307_s19 = int_to_ptr.hbm [resolvable:$true] %s306_s19 }
   0xb   :  { %v171_v13 = vld [vmem:[%s581_s3 + $0x50] sm:$0xff]  ;;  %v172_v14 = vld [vmem:[%s581_s3 + $0x58] sm:$0xff]  ;;  %v371_v15 = vld [vmem:[%s578_s0 + $0x8] sm:$0xff]  ;;  %v178_v17 = vpack.c.bf16 %v164_v12, %v163_v11  ;;  %s412_s20 = smov 128   ;;  %s413_s21 = smov 8  }
   0xc   :  { %v375_v16 = vld [vmem:[%s578_s0 + $0x28] sm:$0xff]  ;;  %v182_v18 = vpack.c.bf16 %v172_v14, %v171_v13  ;;  %v165_v19 = vld [vmem:[%s581_s3 + $0x20] sm:$0xff]  ;;  %v372_v23 = vld [vmem:[%s578_s0 + $0x10] sm:$0xff] }
   0xd   :  { %v166_v20 = vld [vmem:[%s581_s3 + $0x28] sm:$0xff]  ;;  %v173_v21 = vld [vmem:[%s581_s3 + $0x60] sm:$0xff]  ;;  %v376_v24 = vld [vmem:[%s578_s0 + $0x30] sm:$0xff] }
   0xe   :  { %v174_v22 = vld [vmem:[%s581_s3 + $0x68] sm:$0xff]  ;;  %v179_v25 = vpack.c.bf16 %v166_v20, %v165_v19  ;;  %v167_v27 = vld [vmem:[%s581_s3 + $0x30] sm:$0xff]  ;;  %v168_v28 = vld [vmem:[%s581_s3 + $0x38] sm:$0xff] }
   0xf   :  { %v183_v26 = vpack.c.bf16 %v174_v22, %v173_v21  ;;  %v175_v29 = vld [vmem:[%s581_s3 + $0x70] sm:$0xff]  ;;  %v176_v30 = vld [vmem:[%s581_s3 + $0x78] sm:$0xff]  ;;  %v180_v33 = vpack.c.bf16 %v168_v28, %v167_v27  ;;  %v541_v35 = vld [vmem:[%s580_s2] ss:$0 sm:$0xff] }
  0x10   :  { %v373_v31 = vld [vmem:[%s578_s0 + $0x18] sm:$0xff]  ;;  %v184_v34 = vpack.c.bf16 %v176_v30, %v175_v29 }
  0x11   :  { %v377_v32 = vld [vmem:[%s578_s0 + $0x38] sm:$0xff]  ;;  %s411_s0 = smov [#allocation2]  }
  0x12   :  { %s304_s2 = sshll.u32 %s411_s0, 4  ;;  %s305_s2 = int_to_ptr.vmem [resolvable:$true] %s304_s2 }
  0x16   :  { %351 = vmatmul.msk.bf16.gmra.mxu0 %vm83_vm1, %v371_v15  ;;  %355 = vmatmul.msk.bf16.gmra.mxu2 %vm83_vm1, %v375_v16 }
  0x18   :  { %363 = vmatmul.msk.bf16.gmra.mxu1 %vm193_vm2, %v178_v17 }
  0x19   :  { %367 = vmatmul.msk.bf16.gmra.mxu3 %vm193_vm2, %v182_v18 }
  0x26   :  { %352 = vmatmul.msk.bf16.gmra.mxu0 %vm83_vm1, %v372_v23  ;;  %356 = vmatmul.msk.bf16.gmra.mxu2 %vm83_vm1, %v376_v24 }
  0x28   :  { %364 = vmatmul.msk.bf16.gmra.mxu1 %vm193_vm2, %v179_v25 }
  0x29   :  { %368 = vmatmul.msk.bf16.gmra.mxu3 %vm193_vm2, %v183_v26 }
  0x36   :  { %353 = vmatmul.msk.bf16.gmra.mxu0 %vm83_vm1, %v373_v31  ;;  %357 = vmatmul.msk.bf16.gmra.mxu2 %vm83_vm1, %v377_v32 }
  0x38   :  { %365 = vmatmul.msk.bf16.gmra.mxu1 %vm193_vm2, %v180_v33 }
  0x39   :  { %369 = vmatmul.msk.bf16.gmra.mxu3 %vm193_vm2, %v184_v34 }
  0x83   :  { %v121_v36 = vpop.f32.mrf.mxu0 }
  0x84   :  { %v122_v37 = vadd.f32 %v541_v35, %v121_v36 }
  0x85   :  { %v227_v38 = vpop.f32.mrf.mxu1 }
  0x86   :  { %v267_v39 = vadd.f32 %v227_v38, %v122_v37 }
  0x88   :  { %284 = vst.msk [vmem:[#allocation2] sm:$0xff] %vm283_vm3, %v267_v39 }
  0x89   :  { %v141_v40 = vpop.f32.mrf.mxu2 }
  0x8a   :  { %v142_v41 = vadd.f32 %v541_v35, %v141_v40 }
  0x8b   :  { %v123_v43 = vpop.f32.mrf.mxu0 }
  0x8c   :  { %v247_v42 = vpop.f32.mrf.mxu3  ;;  %v124_v45 = vadd.f32 %v541_v35, %v123_v43 }
  0x8d   :  { %v275_v44 = vadd.f32 %v247_v42, %v142_v41  ;;  %v229_v46 = vpop.f32.mrf.mxu1 }
  0x8e   :  { %v268_v47 = vadd.f32 %v229_v46, %v124_v45 }
  0x8f   :  { %292 = vst.msk [vmem:[#allocation2 + $0x40] sm:$0xff] %vm283_vm3, %v275_v44 }
  0x90   :  { %285 = vst.msk [vmem:[#allocation2 + $0x8] sm:$0xff] %vm283_vm3, %v268_v47 }
  0x91   :  { %v143_v48 = vpop.f32.mrf.mxu2 }
  0x92   :  { %v144_v49 = vadd.f32 %v541_v35, %v143_v48 }
  0x93   :  { %v126_v51 = vpop.f32.mrf.mxu0 }
  0x94   :  { %v249_v50 = vpop.f32.mrf.mxu3  ;;  %v127_v53 = vadd.f32 %v541_v35, %v126_v51 }
  0x95   :  { %v276_v52 = vadd.f32 %v249_v50, %v144_v49  ;;  %v232_v54 = vpop.f32.mrf.mxu1 }
  0x96   :  { %v269_v55 = vadd.f32 %v232_v54, %v127_v53 }
  0x97   :  { %293 = vst.msk [vmem:[#allocation2 + $0x48] sm:$0xff] %vm283_vm3, %v276_v52 }
  0x98   :  { %286 = vst.msk [vmem:[#allocation2 + $0x10] sm:$0xff] %vm283_vm3, %v269_v55 }
  0x99   :  { %v146_v56 = vpop.f32.mrf.mxu2 }
  0x9a   :  { %v147_v57 = vadd.f32 %v541_v35, %v146_v56 }
  0x9b   :  { %v128_v59 = vpop.f32.mrf.mxu0 }
  0x9c   :  { %v252_v58 = vpop.f32.mrf.mxu3  ;;  %v129_v61 = vadd.f32 %v541_v35, %v128_v59 }
  0x9d   :  { %v277_v60 = vadd.f32 %v252_v58, %v147_v57  ;;  %v234_v62 = vpop.f32.mrf.mxu1 }
  0x9e   :  { %v270_v63 = vadd.f32 %v234_v62, %v129_v61 }
  0x9f   :  { %294 = vst.msk [vmem:[#allocation2 + $0x50] sm:$0xff] %vm283_vm3, %v277_v60 }
  0xa0   :  { %287 = vst.msk [vmem:[#allocation2 + $0x18] sm:$0xff] %vm283_vm3, %v270_v63 }
  0xa1   :  { %v148_v0 = vpop.f32.mrf.mxu2 }
  0xa2   :  { %v149_v1 = vadd.f32 %v541_v35, %v148_v0 }
  0xa3   :  { %v131_v3 = vpop.f32.mrf.mxu0 }
  0xa4   :  { %v254_v2 = vpop.f32.mrf.mxu3  ;;  %v132_v5 = vadd.f32 %v541_v35, %v131_v3 }
  0xa5   :  { %v278_v4 = vadd.f32 %v254_v2, %v149_v1  ;;  %v237_v6 = vpop.f32.mrf.mxu1 }
  0xa6   :  { %v271_v7 = vadd.f32 %v237_v6, %v132_v5 }
  0xa7   :  { %295 = vst.msk [vmem:[#allocation2 + $0x58] sm:$0xff] %vm283_vm3, %v278_v4 }
  0xa8   :  { %288 = vst.msk [vmem:[#allocation2 + $0x20] sm:$0xff] %vm283_vm3, %v271_v7 }
  0xa9   :  { %v151_v8 = vpop.f32.mrf.mxu2 }
  0xaa   :  { %v152_v9 = vadd.f32 %v541_v35, %v151_v8 }
  0xab   :  { %v133_v11 = vpop.f32.mrf.mxu0 }
  0xac   :  { %v257_v10 = vpop.f32.mrf.mxu3  ;;  %v134_v13 = vadd.f32 %v541_v35, %v133_v11 }
  0xad   :  { %v279_v12 = vadd.f32 %v257_v10, %v152_v9  ;;  %v239_v14 = vpop.f32.mrf.mxu1 }
  0xae   :  { %v272_v15 = vadd.f32 %v239_v14, %v134_v13 }
  0xaf   :  { %296 = vst.msk [vmem:[#allocation2 + $0x60] sm:$0xff] %vm283_vm3, %v279_v12 }
  0xb0   :  { %289 = vst.msk [vmem:[#allocation2 + $0x28] sm:$0xff] %vm283_vm3, %v272_v15 }
  0xb1   :  { %v153_v16 = vpop.f32.mrf.mxu2 }
  0xb2   :  { %v154_v17 = vadd.f32 %v541_v35, %v153_v16 }
  0xb3   :  { %v136_v19 = vpop.f32.mrf.mxu0 }
  0xb4   :  { %v259_v18 = vpop.f32.mrf.mxu3  ;;  %v137_v21 = vadd.f32 %v541_v35, %v136_v19 }
  0xb5   :  { %v280_v20 = vadd.f32 %v259_v18, %v154_v17  ;;  %v242_v22 = vpop.f32.mrf.mxu1 }
  0xb6   :  { %v273_v23 = vadd.f32 %v242_v22, %v137_v21 }
  0xb7   :  { %297 = vst.msk [vmem:[#allocation2 + $0x68] sm:$0xff] %vm283_vm3, %v280_v20 }
  0xb8   :  { %290 = vst.msk [vmem:[#allocation2 + $0x30] sm:$0xff] %vm283_vm3, %v273_v23 }
  0xb9   :  { %v156_v24 = vpop.f32.mrf.mxu2 }
  0xba   :  { %v157_v25 = vadd.f32 %v541_v35, %v156_v24 }
  0xbb   :  { %v138_v27 = vpop.f32.mrf.mxu0 }
  0xbc   :  { %v262_v26 = vpop.f32.mrf.mxu3  ;;  %v139_v29 = vadd.f32 %v541_v35, %v138_v27 }
  0xbd   :  { %v281_v28 = vadd.f32 %v262_v26, %v157_v25  ;;  %v244_v30 = vpop.f32.mrf.mxu1 }
  0xbe   :  { %v274_v31 = vadd.f32 %v244_v30, %v139_v29 }
  0xbf   :  { %298 = vst.msk [vmem:[#allocation2 + $0x70] sm:$0xff] %vm283_vm3, %v281_v28 }
  0xc0   :  { %291 = vst.msk [vmem:[#allocation2 + $0x38] sm:$0xff] %vm283_vm3, %v274_v31 }
  0xc1   :  { %v158_v32 = vpop.f32.mrf.mxu2 }
  0xc2   :  { %v159_v33 = vadd.f32 %v541_v35, %v158_v32 }
  0xc4   :  { %v264_v34 = vpop.f32.mrf.mxu3 }
  0xc5   :  { %v282_v36 = vadd.f32 %v264_v34, %v159_v33 }
  0xc7   :  { %299 = vst.msk [vmem:[#allocation2 + $0x78] sm:$0xff] %vm283_vm3, %v282_v36 }
  0xc8   :  { %312 = dma.vmem_to_hbm [thread:$0]  %s305_s2, 2048, %s307_s19, [#allocation3], %s412_s20, %s412_s20, %s413_s21  }
  0xc9   :  { %409 = dma.done.wait [#allocation3], 2048  }
  0xca   :  { %410 = vsyncadd [#allocation3], 4294965248 }
  0xcb   :  { %317 = vsyncpa [#allocation3], 1 }

</bundles_post_ra>
